<compile_context>
chip_gen: v6e
topology: v6e:2x2x1
jax: 0.10.0
libtpu: 0.0.40
codegen_flags: <defaults>
</compile_context>

<pallas_src>
import jax
import jax.numpy as jnp
from jax.experimental import pallas as pl
from jax.experimental.pallas import tpu as pltpu


def _full_spec(shape):
    """Full-array block, identical for every grid step."""
    n = len(shape)
    return pl.BlockSpec(shape, lambda i: (0,) * n)


def _pick_batch_tile(B):
    # Prefer >=2 grid steps (shards across v7x's two TensorCores) with
    # sublane-aligned (multiple-of-8) tiles; otherwise a single program.
    if B >= 16 and B % 2 == 0 and (B // 2) % 8 == 0:
        return B // 2
    return B


def prepare_params(params, *, P, ratio, rw, matmul_dtype=jnp.bfloat16):
    """One-time, weight-only relayout / constant folding (do NOT call per step)."""
    m = params["adj"].shape[0]
    H = params["w_hh"].shape[1]
    rw = min(int(rw), int(P)) if rw > 0 else 0

    masked_adj = (params["adj"] * params["mask"]).astype(jnp.float32)   # (m, m)
    # Fuse adjacency mixing into the input projection: gx = x @ (A_m @ W_ih^T).
    f_packed = jnp.dot(masked_adj, jnp.transpose(params["w_ih"]))       # (m, 3H)
    whh_packed = jnp.transpose(params["w_hh"])                          # (H, 3H)
    bih = params["b_ih"].reshape(1, 3 * H).astype(jnp.float32)
    bhh = params["b_hh"].reshape(1, 3 * H).astype(jnp.float32)

    w1t = jnp.transpose(params["w1"])                                   # (H, m)
    b1 = params["b1"].reshape(1, m).astype(jnp.float32)
    if rw > 0:
        # Fold the residual ratio/bias into linear1:
        #   out_pre = ratio*(h@W1^T + b1) + (sum_r wres[r]*x[:,t_r,:]) @ A_m + b_res
        w1t = w1t * ratio
        b1 = b1 * ratio + params["b_res"].reshape(1, 1)
        wres = params["w_res"].reshape(rw, 1).astype(jnp.float32)
        adj_mm = masked_adj.astype(matmul_dtype)
    else:
        wres = jnp.zeros((1, 1), jnp.float32)
        adj_mm = jnp.zeros((1, 1), matmul_dtype)

    weights = (f_packed.astype(matmul_dtype),
               whh_packed.astype(matmul_dtype),
               bih, bhh,
               w1t.astype(matmul_dtype), b1,
               adj_mm, wres)
    return {"weights": weights, "P": int(P), "m": int(m), "H": int(H), "rw": rw}


def make_kernel(P, m, H, rw, output_fun="sigmoid"):
    H2, H3 = 2 * H, 3 * H

    def _sigmoid(v):
        # tanh form runs on the EUP slot; avoids exp + divide on the VALU.
        return 0.5 * jnp.tanh(0.5 * v) + 0.5

    def kernel(x_ref, f_ref, whh_ref, bih_ref, bhh_ref,
               w1_ref, b1_ref, adj_ref, wres_ref, out_ref):
        TB = x_ref.shape[0]
        mm_dt = f_ref.dtype

        x = x_ref[...]                                   # (TB, P, m) f32
        # Single fused input-side projection for all timesteps / all gates.
        gx = (jnp.dot(x.astype(mm_dt).reshape(TB * P, m), f_ref[...],
                      preferred_element_type=jnp.float32)
              + bih_ref[...]).reshape(TB, P, H3)         # (TB, P, 3H) f32

        whh = whh_ref[...]                               # (H, 3H) bf16
        bhh = bhh_ref[...]                               # (1, 3H) f32

        # GRU over time, PyTorch gate order [r, z, n]; fully unrolled (P static),
        # h stays in vregs, one MXU push per step.
        h = jnp.zeros((TB, H), jnp.float32)
        for t in range(P):
            gh = jnp.dot(h.astype(mm_dt), whh,
                         preferred_element_type=jnp.float32) + bhh
            gx_t = gx[:, t, :]
            rz = _sigmoid(gx_t[:, :H2] + gh[:, :H2])     # fused r|z sigmoid
            r = rz[:, :H]
            z = rz[:, H:H2]
            n = jnp.tanh(gx_t[:, H2:] + r * gh[:, H2:])
            h = (1.0 - z) * n + z * h

        # TODO(synk): nn.Dropout treated as identity (inference / eval mode).
        # ratio and b_res are pre-folded into w1_ref / b1_ref when rw > 0.
        res = (jnp.dot(h.astype(mm_dt), w1_ref[...],
                       preferred_element_type=jnp.float32)
               + b1_ref[...])                            # (TB, m)

        if rw > 0:
            # Fold w_res into the time reduction first (rw VPU FMAs), then one
            # (TB,m)x(m,m) matmul -- no cross-sublane reduce.
            wres = wres_ref[...]                         # (rw, 1) f32
            xt = x[:, P - rw:, :]                        # (TB, rw, m)
            acc = xt[:, 0, :] * wres[0:1, 0:1]
            for r_i in range(1, rw):
                acc = acc + xt[:, r_i, :] * wres[r_i:r_i + 1, 0:1]
            zres = jnp.dot(acc.astype(adj_ref.dtype), adj_ref[...],
                           preferred_element_type=jnp.float32)
            res = res + zres

        if output_fun == "sigmoid":
            res = _sigmoid(res)
        elif output_fun == "tanh":
            res = jnp.tanh(res)

        out_ref[...] = res.astype(out_ref.dtype)

    return kernel


def model_forward(x, prepared, *, output_fun="sigmoid", batch_tile=None):
    """x: (B, P, m) float32  ->  (B, m) float32"""
    B, P, m = x.shape
    assert P == prepared["P"] and m == prepared["m"]
    H, rw = prepared["H"], prepared["rw"]
    if batch_tile is None:
        batch_tile = _pick_batch_tile(B)
    assert B % batch_tile == 0

    weights = prepared["weights"]
    kernel = make_kernel(P, m, H, rw, output_fun)

    grid = (B // batch_tile,)
    in_specs = ([pl.BlockSpec((batch_tile, P, m), lambda i: (i, 0, 0))]
                + [_full_spec(w.shape) for w in weights])
    out_spec = pl.BlockSpec((batch_tile, m), lambda i: (i, 0))

    return pl.pallas_call(
        kernel,
        out_shape=jax.ShapeDtypeStruct((B, m), jnp.float32),
        grid=grid,
        in_specs=in_specs,
        out_specs=out_spec,
        compiler_params=pltpu.CompilerParams(
            dimension_semantics=("parallel",)),
    )(x, *weights)


def reference_forward(x, params, *, ratio, rw, output_fun="sigmoid"):
    """Pure-JAX f32 reference mirroring the PyTorch module."""
    B, P, m = x.shape
    H = params["w_hh"].shape[1]
    rw = min(rw, P) if rw > 0 else 0
    ma = params["adj"] * params["mask"]
    xa = jnp.einsum("bpm,mn->bpn", x, ma)
    wih, whh, bih, bhh = (params["w_ih"], params["w_hh"],
                          params["b_ih"], params["b_hh"])
    h = jnp.zeros((B, H), jnp.float32)
    for t in range(P):
        gi = xa[:, t, :] @ wih.T + bih
        gh = h @ whh.T + bhh
        r = jax.nn.sigmoid(gi[:, :H] + gh[:, :H])
        z = jax.nn.sigmoid(gi[:, H:2 * H] + gh[:, H:2 * H])
        n = jnp.tanh(gi[:, 2 * H:] + r * gh[:, 2 * H:])
        h = (1.0 - z) * n + z * h
    res = h @ params["w1"].T + params["b1"]
    if rw > 0:
        ztail = xa[:, P - rw:, :]
        zres = jnp.einsum("brm,r->bm", ztail, params["w_res"]) + params["b_res"]
        res = res * ratio + zres
    if output_fun == "sigmoid":
        res = jax.nn.sigmoid(res)
    elif output_fun == "tanh":
        res = jnp.tanh(res)
    return res


def init_params(key, m, H, rw):
    ks = jax.random.split(key, 10)
    s = 1.0 / jnp.sqrt(H)
    u = lambda k, shape, sc: jax.random.uniform(k, shape, jnp.float32, -sc, sc)
    return {
        "adj":   jax.random.uniform(ks[0], (m, m), jnp.float32, 0.0, 1.0),
        "mask":  u(ks[1], (m, m), 1.0),
        "w_ih":  u(ks[2], (3 * H, m), s),
        "w_hh":  u(ks[3], (3 * H, H), s),
        "b_ih":  u(ks[4], (3 * H,), s),
        "b_hh":  u(ks[5], (3 * H,), s),
        "w1":    u(ks[6], (m, H), 1.0 / jnp.sqrt(H)),
        "b1":    u(ks[7], (m,), 1.0 / jnp.sqrt(H)),
        "w_res": u(ks[8], (rw,), 1.0 / jnp.sqrt(rw)),
        "b_res": u(ks[9], (), 1.0 / jnp.sqrt(rw)),
    }


if __name__ == "__main__":
    # args: window P=8, hidRNN=32, residual_window=4, ratio=0.5,
    #       output_fun='sigmoid'; data: m=16 nodes; batch B=4.
    B, P, m, H, rw = 4, 8, 16, 32, 4
    ratio = 0.5

    key = jax.random.PRNGKey(0)
    kx, kp = jax.random.split(key)
    x = jax.random.normal(kx, (B, P, m), jnp.float32)
    params = init_params(kp, m, H, rw)

    # One-time weight prep (constant folding + packing + bf16 cast).
    prepared = prepare_params(params, P=P, ratio=ratio, rw=rw,
                              matmul_dtype=jnp.bfloat16)

    out = model_forward(x, prepared, output_fun="sigmoid")
    out = jax.block_until_ready(out)

    ref = reference_forward(x, params, ratio=ratio, rw=rw, output_fun="sigmoid")
    assert out.shape == (B, m)
    # Tolerance accounts for bf16 matmul operands (f32 accumulation); outputs
    # are sigmoid-bounded so absolute error stays well below this.
    assert jnp.allclose(out, ref, rtol=2e-2, atol=1e-2), (
        f"max abs err {jnp.max(jnp.abs(out - ref))}")
    print("KERNEL_OK")
</pallas_src>

<mosaic_0001>
module attributes {stable_mosaic.version = 11 : i64} {
  func.func @kernel(%arg0: i32, %arg1: memref<4x8x16xf32, #tpu.memory_space<vmem>>, %arg2: memref<16x96xbf16, #tpu.memory_space<vmem>>, %arg3: memref<32x96xbf16, #tpu.memory_space<vmem>>, %arg4: memref<1x96xf32, #tpu.memory_space<vmem>>, %arg5: memref<1x96xf32, #tpu.memory_space<vmem>>, %arg6: memref<32x16xbf16, #tpu.memory_space<vmem>>, %arg7: memref<1x16xf32, #tpu.memory_space<vmem>>, %arg8: memref<16x16xbf16, #tpu.memory_space<vmem>>, %arg9: memref<4x1xf32, #tpu.memory_space<vmem>>, %arg10: memref<4x16xf32, #tpu.memory_space<vmem>>) attributes {dimension_semantics = [#tpu.dimension_semantics<parallel>], iteration_bounds = array<i64: 1>, scalar_prefetch = 0 : i64, scratch_operands = 0 : i64, tpu.core_type = #tpu.core_type<tc>, window_params = [{transform_indices = @transform_0, window_bounds = array<i64: 4, 8, 16>}, {pipeline_mode = #tpu.pipeline_mode<synchronous>, transform_indices = @transform_1, window_bounds = array<i64: 16, 96>}, {pipeline_mode = #tpu.pipeline_mode<synchronous>, transform_indices = @transform_2, window_bounds = array<i64: 32, 96>}, {pipeline_mode = #tpu.pipeline_mode<synchronous>, transform_indices = @transform_3, window_bounds = array<i64: 1, 96>}, {pipeline_mode = #tpu.pipeline_mode<synchronous>, transform_indices = @transform_4, window_bounds = array<i64: 1, 96>}, {pipeline_mode = #tpu.pipeline_mode<synchronous>, transform_indices = @transform_5, window_bounds = array<i64: 32, 16>}, {pipeline_mode = #tpu.pipeline_mode<synchronous>, transform_indices = @transform_6, window_bounds = array<i64: 1, 16>}, {pipeline_mode = #tpu.pipeline_mode<synchronous>, transform_indices = @transform_7, window_bounds = array<i64: 16, 16>}, {pipeline_mode = #tpu.pipeline_mode<synchronous>, transform_indices = @transform_8, window_bounds = array<i64: 4, 1>}, {transform_indices = @transform_9, window_bounds = array<i64: 4, 16>}]} {
    %c0 = arith.constant 0 : index
    %c0_0 = arith.constant 0 : index
    %c0_1 = arith.constant 0 : index
    %0 = vector.load %arg1[%c0, %c0_0, %c0_1] : memref<4x8x16xf32, #tpu.memory_space<vmem>>, vector<4x8x16xf32>
    %1 = arith.truncf %0 : vector<4x8x16xf32> to vector<4x8x16xbf16>
    %2 = vector.shape_cast %1 : vector<4x8x16xbf16> to vector<32x16xbf16>
    %c0_2 = arith.constant 0 : index
    %c0_3 = arith.constant 0 : index
    %3 = vector.load %arg2[%c0_2, %c0_3] : memref<16x96xbf16, #tpu.memory_space<vmem>>, vector<16x96xbf16>
    %cst = arith.constant dense<0.000000e+00> : vector<32x96xf32>
    %4 = tpu.matmul %2, %3, %cst {dimension_numbers = #tpu.dot_dimension_numbers<[1], [0], [0], [1], [0, 0, 1, 1], [], []>} : vector<32x16xbf16>, vector<16x96xbf16>, vector<32x96xf32> -> vector<32x96xf32>
    %c0_4 = arith.constant 0 : index
    %c0_5 = arith.constant 0 : index
    %5 = vector.load %arg4[%c0_4, %c0_5] : memref<1x96xf32, #tpu.memory_space<vmem>>, vector<1x96xf32>
    %6 = vector.broadcast %5 : vector<1x96xf32> to vector<32x96xf32>
    %7 = arith.addf %4, %6 : vector<32x96xf32>
    %8 = vector.shape_cast %7 : vector<32x96xf32> to vector<4x8x96xf32>
    %c0_6 = arith.constant 0 : index
    %c0_7 = arith.constant 0 : index
    %9 = vector.load %arg3[%c0_6, %c0_7] : memref<32x96xbf16, #tpu.memory_space<vmem>>, vector<32x96xbf16>
    %c0_8 = arith.constant 0 : index
    %c0_9 = arith.constant 0 : index
    %10 = vector.load %arg5[%c0_8, %c0_9] : memref<1x96xf32, #tpu.memory_space<vmem>>, vector<1x96xf32>
    %cst_10 = arith.constant 0.000000e+00 : f32
    %11 = vector.broadcast %cst_10 : f32 to vector<4x32xf32>
    %12 = arith.truncf %11 : vector<4x32xf32> to vector<4x32xbf16>
    %cst_11 = arith.constant dense<0.000000e+00> : vector<4x96xf32>
    %13 = tpu.matmul %12, %9, %cst_11 {dimension_numbers = #tpu.dot_dimension_numbers<[1], [0], [0], [1], [0, 0, 1, 1], [], []>} : vector<4x32xbf16>, vector<32x96xbf16>, vector<4x96xf32> -> vector<4x96xf32>
    %14 = vector.broadcast %10 : vector<1x96xf32> to vector<4x96xf32>
    %15 = arith.addf %13, %14 : vector<4x96xf32>
    %16 = vector.extract_strided_slice %8 {offsets = [0, 0, 0], sizes = [4, 1, 96], strides = [1, 1, 1]} : vector<4x8x96xf32> to vector<4x1x96xf32>
    %17 = vector.shape_cast %16 : vector<4x1x96xf32> to vector<4x96xf32>
    %18 = vector.extract_strided_slice %17 {offsets = [0, 0], sizes = [4, 64], strides = [1, 1]} : vector<4x96xf32> to vector<4x64xf32>
    %19 = vector.extract_strided_slice %15 {offsets = [0, 0], sizes = [4, 64], strides = [1, 1]} : vector<4x96xf32> to vector<4x64xf32>
    %20 = arith.addf %18, %19 : vector<4x64xf32>
    %cst_12 = arith.constant 5.000000e-01 : f32
    %21 = vector.broadcast %cst_12 : f32 to vector<4x64xf32>
    %22 = arith.mulf %21, %20 : vector<4x64xf32>
    %23 = math.tanh %22 : vector<4x64xf32>
    %cst_13 = arith.constant 5.000000e-01 : f32
    %24 = vector.broadcast %cst_13 : f32 to vector<4x64xf32>
    %25 = arith.mulf %24, %23 : vector<4x64xf32>
    %cst_14 = arith.constant 5.000000e-01 : f32
    %26 = vector.broadcast %cst_14 : f32 to vector<4x64xf32>
    %27 = arith.addf %25, %26 : vector<4x64xf32>
    %28 = vector.extract_strided_slice %27 {offsets = [0, 0], sizes = [4, 32], strides = [1, 1]} : vector<4x64xf32> to vector<4x32xf32>
    %29 = vector.extract_strided_slice %27 {offsets = [0, 32], sizes = [4, 32], strides = [1, 1]} : vector<4x64xf32> to vector<4x32xf32>
    %30 = vector.extract_strided_slice %17 {offsets = [0, 64], sizes = [4, 32], strides = [1, 1]} : vector<4x96xf32> to vector<4x32xf32>
    %31 = vector.extract_strided_slice %15 {offsets = [0, 64], sizes = [4, 32], strides = [1, 1]} : vector<4x96xf32> to vector<4x32xf32>
    %32 = arith.mulf %28, %31 : vector<4x32xf32>
    %33 = arith.addf %30, %32 : vector<4x32xf32>
    %34 = math.tanh %33 : vector<4x32xf32>
    %cst_15 = arith.constant 1.000000e+00 : f32
    %35 = vector.broadcast %cst_15 : f32 to vector<4x32xf32>
    %36 = arith.subf %35, %29 : vector<4x32xf32>
    %37 = arith.mulf %36, %34 : vector<4x32xf32>
    %38 = arith.mulf %29, %11 : vector<4x32xf32>
    %39 = arith.addf %37, %38 : vector<4x32xf32>
    %40 = arith.truncf %39 : vector<4x32xf32> to vector<4x32xbf16>
    %cst_16 = arith.constant dense<0.000000e+00> : vector<4x96xf32>
    %41 = tpu.matmul %40, %9, %cst_16 {dimension_numbers = #tpu.dot_dimension_numbers<[1], [0], [0], [1], [0, 0, 1, 1], [], []>} : vector<4x32xbf16>, vector<32x96xbf16>, vector<4x96xf32> -> vector<4x96xf32>
    %42 = vector.broadcast %10 : vector<1x96xf32> to vector<4x96xf32>
    %43 = arith.addf %41, %42 : vector<4x96xf32>
    %44 = vector.extract_strided_slice %8 {offsets = [0, 1, 0], sizes = [4, 1, 96], strides = [1, 1, 1]} : vector<4x8x96xf32> to vector<4x1x96xf32>
    %45 = vector.shape_cast %44 : vector<4x1x96xf32> to vector<4x96xf32>
    %46 = vector.extract_strided_slice %45 {offsets = [0, 0], sizes = [4, 64], strides = [1, 1]} : vector<4x96xf32> to vector<4x64xf32>
    %47 = vector.extract_strided_slice %43 {offsets = [0, 0], sizes = [4, 64], strides = [1, 1]} : vector<4x96xf32> to vector<4x64xf32>
    %48 = arith.addf %46, %47 : vector<4x64xf32>
    %cst_17 = arith.constant 5.000000e-01 : f32
    %49 = vector.broadcast %cst_17 : f32 to vector<4x64xf32>
    %50 = arith.mulf %49, %48 : vector<4x64xf32>
    %51 = math.tanh %50 : vector<4x64xf32>
    %cst_18 = arith.constant 5.000000e-01 : f32
    %52 = vector.broadcast %cst_18 : f32 to vector<4x64xf32>
    %53 = arith.mulf %52, %51 : vector<4x64xf32>
    %cst_19 = arith.constant 5.000000e-01 : f32
    %54 = vector.broadcast %cst_19 : f32 to vector<4x64xf32>
    %55 = arith.addf %53, %54 : vector<4x64xf32>
    %56 = vector.extract_strided_slice %55 {offsets = [0, 0], sizes = [4, 32], strides = [1, 1]} : vector<4x64xf32> to vector<4x32xf32>
    %57 = vector.extract_strided_slice %55 {offsets = [0, 32], sizes = [4, 32], strides = [1, 1]} : vector<4x64xf32> to vector<4x32xf32>
    %58 = vector.extract_strided_slice %45 {offsets = [0, 64], sizes = [4, 32], strides = [1, 1]} : vector<4x96xf32> to vector<4x32xf32>
    %59 = vector.extract_strided_slice %43 {offsets = [0, 64], sizes = [4, 32], strides = [1, 1]} : vector<4x96xf32> to vector<4x32xf32>
    %60 = arith.mulf %56, %59 : vector<4x32xf32>
    %61 = arith.addf %58, %60 : vector<4x32xf32>
    %62 = math.tanh %61 : vector<4x32xf32>
    %cst_20 = arith.constant 1.000000e+00 : f32
    %63 = vector.broadcast %cst_20 : f32 to vector<4x32xf32>
    %64 = arith.subf %63, %57 : vector<4x32xf32>
    %65 = arith.mulf %64, %62 : vector<4x32xf32>
    %66 = arith.mulf %57, %39 : vector<4x32xf32>
    %67 = arith.addf %65, %66 : vector<4x32xf32>
    %68 = arith.truncf %67 : vector<4x32xf32> to vector<4x32xbf16>
    %cst_21 = arith.constant dense<0.000000e+00> : vector<4x96xf32>
    %69 = tpu.matmul %68, %9, %cst_21 {dimension_numbers = #tpu.dot_dimension_numbers<[1], [0], [0], [1], [0, 0, 1, 1], [], []>} : vector<4x32xbf16>, vector<32x96xbf16>, vector<4x96xf32> -> vector<4x96xf32>
    %70 = vector.broadcast %10 : vector<1x96xf32> to vector<4x96xf32>
    %71 = arith.addf %69, %70 : vector<4x96xf32>
    %72 = vector.extract_strided_slice %8 {offsets = [0, 2, 0], sizes = [4, 1, 96], strides = [1, 1, 1]} : vector<4x8x96xf32> to vector<4x1x96xf32>
    %73 = vector.shape_cast %72 : vector<4x1x96xf32> to vector<4x96xf32>
    %74 = vector.extract_strided_slice %73 {offsets = [0, 0], sizes = [4, 64], strides = [1, 1]} : vector<4x96xf32> to vector<4x64xf32>
    %75 = vector.extract_strided_slice %71 {offsets = [0, 0], sizes = [4, 64], strides = [1, 1]} : vector<4x96xf32> to vector<4x64xf32>
    %76 = arith.addf %74, %75 : vector<4x64xf32>
    %cst_22 = arith.constant 5.000000e-01 : f32
    %77 = vector.broadcast %cst_22 : f32 to vector<4x64xf32>
    %78 = arith.mulf %77, %76 : vector<4x64xf32>
    %79 = math.tanh %78 : vector<4x64xf32>
    %cst_23 = arith.constant 5.000000e-01 : f32
    %80 = vector.broadcast %cst_23 : f32 to vector<4x64xf32>
    %81 = arith.mulf %80, %79 : vector<4x64xf32>
    %cst_24 = arith.constant 5.000000e-01 : f32
    %82 = vector.broadcast %cst_24 : f32 to vector<4x64xf32>
    %83 = arith.addf %81, %82 : vector<4x64xf32>
    %84 = vector.extract_strided_slice %83 {offsets = [0, 0], sizes = [4, 32], strides = [1, 1]} : vector<4x64xf32> to vector<4x32xf32>
    %85 = vector.extract_strided_slice %83 {offsets = [0, 32], sizes = [4, 32], strides = [1, 1]} : vector<4x64xf32> to vector<4x32xf32>
    %86 = vector.extract_strided_slice %73 {offsets = [0, 64], sizes = [4, 32], strides = [1, 1]} : vector<4x96xf32> to vector<4x32xf32>
    %87 = vector.extract_strided_slice %71 {offsets = [0, 64], sizes = [4, 32], strides = [1, 1]} : vector<4x96xf32> to vector<4x32xf32>
    %88 = arith.mulf %84, %87 : vector<4x32xf32>
    %89 = arith.addf %86, %88 : vector<4x32xf32>
    %90 = math.tanh %89 : vector<4x32xf32>
    %cst_25 = arith.constant 1.000000e+00 : f32
    %91 = vector.broadcast %cst_25 : f32 to vector<4x32xf32>
    %92 = arith.subf %91, %85 : vector<4x32xf32>
    %93 = arith.mulf %92, %90 : vector<4x32xf32>
    %94 = arith.mulf %85, %67 : vector<4x32xf32>
    %95 = arith.addf %93, %94 : vector<4x32xf32>
    %96 = arith.truncf %95 : vector<4x32xf32> to vector<4x32xbf16>
    %cst_26 = arith.constant dense<0.000000e+00> : vector<4x96xf32>
    %97 = tpu.matmul %96, %9, %cst_26 {dimension_numbers = #tpu.dot_dimension_numbers<[1], [0], [0], [1], [0, 0, 1, 1], [], []>} : vector<4x32xbf16>, vector<32x96xbf16>, vector<4x96xf32> -> vector<4x96xf32>
    %98 = vector.broadcast %10 : vector<1x96xf32> to vector<4x96xf32>
    %99 = arith.addf %97, %98 : vector<4x96xf32>
    %100 = vector.extract_strided_slice %8 {offsets = [0, 3, 0], sizes = [4, 1, 96], strides = [1, 1, 1]} : vector<4x8x96xf32> to vector<4x1x96xf32>
    %101 = vector.shape_cast %100 : vector<4x1x96xf32> to vector<4x96xf32>
    %102 = vector.extract_strided_slice %101 {offsets = [0, 0], sizes = [4, 64], strides = [1, 1]} : vector<4x96xf32> to vector<4x64xf32>
    %103 = vector.extract_strided_slice %99 {offsets = [0, 0], sizes = [4, 64], strides = [1, 1]} : vector<4x96xf32> to vector<4x64xf32>
    %104 = arith.addf %102, %103 : vector<4x64xf32>
    %cst_27 = arith.constant 5.000000e-01 : f32
    %105 = vector.broadcast %cst_27 : f32 to vector<4x64xf32>
    %106 = arith.mulf %105, %104 : vector<4x64xf32>
    %107 = math.tanh %106 : vector<4x64xf32>
    %cst_28 = arith.constant 5.000000e-01 : f32
    %108 = vector.broadcast %cst_28 : f32 to vector<4x64xf32>
    %109 = arith.mulf %108, %107 : vector<4x64xf32>
    %cst_29 = arith.constant 5.000000e-01 : f32
    %110 = vector.broadcast %cst_29 : f32 to vector<4x64xf32>
    %111 = arith.addf %109, %110 : vector<4x64xf32>
    %112 = vector.extract_strided_slice %111 {offsets = [0, 0], sizes = [4, 32], strides = [1, 1]} : vector<4x64xf32> to vector<4x32xf32>
    %113 = vector.extract_strided_slice %111 {offsets = [0, 32], sizes = [4, 32], strides = [1, 1]} : vector<4x64xf32> to vector<4x32xf32>
    %114 = vector.extract_strided_slice %101 {offsets = [0, 64], sizes = [4, 32], strides = [1, 1]} : vector<4x96xf32> to vector<4x32xf32>
    %115 = vector.extract_strided_slice %99 {offsets = [0, 64], sizes = [4, 32], strides = [1, 1]} : vector<4x96xf32> to vector<4x32xf32>
    %116 = arith.mulf %112, %115 : vector<4x32xf32>
    %117 = arith.addf %114, %116 : vector<4x32xf32>
    %118 = math.tanh %117 : vector<4x32xf32>
    %cst_30 = arith.constant 1.000000e+00 : f32
    %119 = vector.broadcast %cst_30 : f32 to vector<4x32xf32>
    %120 = arith.subf %119, %113 : vector<4x32xf32>
    %121 = arith.mulf %120, %118 : vector<4x32xf32>
    %122 = arith.mulf %113, %95 : vector<4x32xf32>
    %123 = arith.addf %121, %122 : vector<4x32xf32>
    %124 = arith.truncf %123 : vector<4x32xf32> to vector<4x32xbf16>
    %cst_31 = arith.constant dense<0.000000e+00> : vector<4x96xf32>
    %125 = tpu.matmul %124, %9, %cst_31 {dimension_numbers = #tpu.dot_dimension_numbers<[1], [0], [0], [1], [0, 0, 1, 1], [], []>} : vector<4x32xbf16>, vector<32x96xbf16>, vector<4x96xf32> -> vector<4x96xf32>
    %126 = vector.broadcast %10 : vector<1x96xf32> to vector<4x96xf32>
    %127 = arith.addf %125, %126 : vector<4x96xf32>
    %128 = vector.extract_strided_slice %8 {offsets = [0, 4, 0], sizes = [4, 1, 96], strides = [1, 1, 1]} : vector<4x8x96xf32> to vector<4x1x96xf32>
    %129 = vector.shape_cast %128 : vector<4x1x96xf32> to vector<4x96xf32>
    %130 = vector.extract_strided_slice %129 {offsets = [0, 0], sizes = [4, 64], strides = [1, 1]} : vector<4x96xf32> to vector<4x64xf32>
    %131 = vector.extract_strided_slice %127 {offsets = [0, 0], sizes = [4, 64], strides = [1, 1]} : vector<4x96xf32> to vector<4x64xf32>
    %132 = arith.addf %130, %131 : vector<4x64xf32>
    %cst_32 = arith.constant 5.000000e-01 : f32
    %133 = vector.broadcast %cst_32 : f32 to vector<4x64xf32>
    %134 = arith.mulf %133, %132 : vector<4x64xf32>
    %135 = math.tanh %134 : vector<4x64xf32>
    %cst_33 = arith.constant 5.000000e-01 : f32
    %136 = vector.broadcast %cst_33 : f32 to vector<4x64xf32>
    %137 = arith.mulf %136, %135 : vector<4x64xf32>
    %cst_34 = arith.constant 5.000000e-01 : f32
    %138 = vector.broadcast %cst_34 : f32 to vector<4x64xf32>
    %139 = arith.addf %137, %138 : vector<4x64xf32>
    %140 = vector.extract_strided_slice %139 {offsets = [0, 0], sizes = [4, 32], strides = [1, 1]} : vector<4x64xf32> to vector<4x32xf32>
    %141 = vector.extract_strided_slice %139 {offsets = [0, 32], sizes = [4, 32], strides = [1, 1]} : vector<4x64xf32> to vector<4x32xf32>
    %142 = vector.extract_strided_slice %129 {offsets = [0, 64], sizes = [4, 32], strides = [1, 1]} : vector<4x96xf32> to vector<4x32xf32>
    %143 = vector.extract_strided_slice %127 {offsets = [0, 64], sizes = [4, 32], strides = [1, 1]} : vector<4x96xf32> to vector<4x32xf32>
    %144 = arith.mulf %140, %143 : vector<4x32xf32>
    %145 = arith.addf %142, %144 : vector<4x32xf32>
    %146 = math.tanh %145 : vector<4x32xf32>
    %cst_35 = arith.constant 1.000000e+00 : f32
    %147 = vector.broadcast %cst_35 : f32 to vector<4x32xf32>
    %148 = arith.subf %147, %141 : vector<4x32xf32>
    %149 = arith.mulf %148, %146 : vector<4x32xf32>
    %150 = arith.mulf %141, %123 : vector<4x32xf32>
    %151 = arith.addf %149, %150 : vector<4x32xf32>
    %152 = arith.truncf %151 : vector<4x32xf32> to vector<4x32xbf16>
    %cst_36 = arith.constant dense<0.000000e+00> : vector<4x96xf32>
    %153 = tpu.matmul %152, %9, %cst_36 {dimension_numbers = #tpu.dot_dimension_numbers<[1], [0], [0], [1], [0, 0, 1, 1], [], []>} : vector<4x32xbf16>, vector<32x96xbf16>, vector<4x96xf32> -> vector<4x96xf32>
    %154 = vector.broadcast %10 : vector<1x96xf32> to vector<4x96xf32>
    %155 = arith.addf %153, %154 : vector<4x96xf32>
    %156 = vector.extract_strided_slice %8 {offsets = [0, 5, 0], sizes = [4, 1, 96], strides = [1, 1, 1]} : vector<4x8x96xf32> to vector<4x1x96xf32>
    %157 = vector.shape_cast %156 : vector<4x1x96xf32> to vector<4x96xf32>
    %158 = vector.extract_strided_slice %157 {offsets = [0, 0], sizes = [4, 64], strides = [1, 1]} : vector<4x96xf32> to vector<4x64xf32>
    %159 = vector.extract_strided_slice %155 {offsets = [0, 0], sizes = [4, 64], strides = [1, 1]} : vector<4x96xf32> to vector<4x64xf32>
    %160 = arith.addf %158, %159 : vector<4x64xf32>
    %cst_37 = arith.constant 5.000000e-01 : f32
    %161 = vector.broadcast %cst_37 : f32 to vector<4x64xf32>
    %162 = arith.mulf %161, %160 : vector<4x64xf32>
    %163 = math.tanh %162 : vector<4x64xf32>
    %cst_38 = arith.constant 5.000000e-01 : f32
    %164 = vector.broadcast %cst_38 : f32 to vector<4x64xf32>
    %165 = arith.mulf %164, %163 : vector<4x64xf32>
    %cst_39 = arith.constant 5.000000e-01 : f32
    %166 = vector.broadcast %cst_39 : f32 to vector<4x64xf32>
    %167 = arith.addf %165, %166 : vector<4x64xf32>
    %168 = vector.extract_strided_slice %167 {offsets = [0, 0], sizes = [4, 32], strides = [1, 1]} : vector<4x64xf32> to vector<4x32xf32>
    %169 = vector.extract_strided_slice %167 {offsets = [0, 32], sizes = [4, 32], strides = [1, 1]} : vector<4x64xf32> to vector<4x32xf32>
    %170 = vector.extract_strided_slice %157 {offsets = [0, 64], sizes = [4, 32], strides = [1, 1]} : vector<4x96xf32> to vector<4x32xf32>
    %171 = vector.extract_strided_slice %155 {offsets = [0, 64], sizes = [4, 32], strides = [1, 1]} : vector<4x96xf32> to vector<4x32xf32>
    %172 = arith.mulf %168, %171 : vector<4x32xf32>
    %173 = arith.addf %170, %172 : vector<4x32xf32>
    %174 = math.tanh %173 : vector<4x32xf32>
    %cst_40 = arith.constant 1.000000e+00 : f32
    %175 = vector.broadcast %cst_40 : f32 to vector<4x32xf32>
    %176 = arith.subf %175, %169 : vector<4x32xf32>
    %177 = arith.mulf %176, %174 : vector<4x32xf32>
    %178 = arith.mulf %169, %151 : vector<4x32xf32>
    %179 = arith.addf %177, %178 : vector<4x32xf32>
    %180 = arith.truncf %179 : vector<4x32xf32> to vector<4x32xbf16>
    %cst_41 = arith.constant dense<0.000000e+00> : vector<4x96xf32>
    %181 = tpu.matmul %180, %9, %cst_41 {dimension_numbers = #tpu.dot_dimension_numbers<[1], [0], [0], [1], [0, 0, 1, 1], [], []>} : vector<4x32xbf16>, vector<32x96xbf16>, vector<4x96xf32> -> vector<4x96xf32>
    %182 = vector.broadcast %10 : vector<1x96xf32> to vector<4x96xf32>
    %183 = arith.addf %181, %182 : vector<4x96xf32>
    %184 = vector.extract_strided_slice %8 {offsets = [0, 6, 0], sizes = [4, 1, 96], strides = [1, 1, 1]} : vector<4x8x96xf32> to vector<4x1x96xf32>
    %185 = vector.shape_cast %184 : vector<4x1x96xf32> to vector<4x96xf32>
    %186 = vector.extract_strided_slice %185 {offsets = [0, 0], sizes = [4, 64], strides = [1, 1]} : vector<4x96xf32> to vector<4x64xf32>
    %187 = vector.extract_strided_slice %183 {offsets = [0, 0], sizes = [4, 64], strides = [1, 1]} : vector<4x96xf32> to vector<4x64xf32>
    %188 = arith.addf %186, %187 : vector<4x64xf32>
    %cst_42 = arith.constant 5.000000e-01 : f32
    %189 = vector.broadcast %cst_42 : f32 to vector<4x64xf32>
    %190 = arith.mulf %189, %188 : vector<4x64xf32>
    %191 = math.tanh %190 : vector<4x64xf32>
    %cst_43 = arith.constant 5.000000e-01 : f32
    %192 = vector.broadcast %cst_43 : f32 to vector<4x64xf32>
    %193 = arith.mulf %192, %191 : vector<4x64xf32>
    %cst_44 = arith.constant 5.000000e-01 : f32
    %194 = vector.broadcast %cst_44 : f32 to vector<4x64xf32>
    %195 = arith.addf %193, %194 : vector<4x64xf32>
    %196 = vector.extract_strided_slice %195 {offsets = [0, 0], sizes = [4, 32], strides = [1, 1]} : vector<4x64xf32> to vector<4x32xf32>
    %197 = vector.extract_strided_slice %195 {offsets = [0, 32], sizes = [4, 32], strides = [1, 1]} : vector<4x64xf32> to vector<4x32xf32>
    %198 = vector.extract_strided_slice %185 {offsets = [0, 64], sizes = [4, 32], strides = [1, 1]} : vector<4x96xf32> to vector<4x32xf32>
    %199 = vector.extract_strided_slice %183 {offsets = [0, 64], sizes = [4, 32], strides = [1, 1]} : vector<4x96xf32> to vector<4x32xf32>
    %200 = arith.mulf %196, %199 : vector<4x32xf32>
    %201 = arith.addf %198, %200 : vector<4x32xf32>
    %202 = math.tanh %201 : vector<4x32xf32>
    %cst_45 = arith.constant 1.000000e+00 : f32
    %203 = vector.broadcast %cst_45 : f32 to vector<4x32xf32>
    %204 = arith.subf %203, %197 : vector<4x32xf32>
    %205 = arith.mulf %204, %202 : vector<4x32xf32>
    %206 = arith.mulf %197, %179 : vector<4x32xf32>
    %207 = arith.addf %205, %206 : vector<4x32xf32>
    %208 = arith.truncf %207 : vector<4x32xf32> to vector<4x32xbf16>
    %cst_46 = arith.constant dense<0.000000e+00> : vector<4x96xf32>
    %209 = tpu.matmul %208, %9, %cst_46 {dimension_numbers = #tpu.dot_dimension_numbers<[1], [0], [0], [1], [0, 0, 1, 1], [], []>} : vector<4x32xbf16>, vector<32x96xbf16>, vector<4x96xf32> -> vector<4x96xf32>
    %210 = vector.broadcast %10 : vector<1x96xf32> to vector<4x96xf32>
    %211 = arith.addf %209, %210 : vector<4x96xf32>
    %212 = vector.extract_strided_slice %8 {offsets = [0, 7, 0], sizes = [4, 1, 96], strides = [1, 1, 1]} : vector<4x8x96xf32> to vector<4x1x96xf32>
    %213 = vector.shape_cast %212 : vector<4x1x96xf32> to vector<4x96xf32>
    %214 = vector.extract_strided_slice %213 {offsets = [0, 0], sizes = [4, 64], strides = [1, 1]} : vector<4x96xf32> to vector<4x64xf32>
    %215 = vector.extract_strided_slice %211 {offsets = [0, 0], sizes = [4, 64], strides = [1, 1]} : vector<4x96xf32> to vector<4x64xf32>
    %216 = arith.addf %214, %215 : vector<4x64xf32>
    %cst_47 = arith.constant 5.000000e-01 : f32
    %217 = vector.broadcast %cst_47 : f32 to vector<4x64xf32>
    %218 = arith.mulf %217, %216 : vector<4x64xf32>
    %219 = math.tanh %218 : vector<4x64xf32>
    %cst_48 = arith.constant 5.000000e-01 : f32
    %220 = vector.broadcast %cst_48 : f32 to vector<4x64xf32>
    %221 = arith.mulf %220, %219 : vector<4x64xf32>
    %cst_49 = arith.constant 5.000000e-01 : f32
    %222 = vector.broadcast %cst_49 : f32 to vector<4x64xf32>
    %223 = arith.addf %221, %222 : vector<4x64xf32>
    %224 = vector.extract_strided_slice %223 {offsets = [0, 0], sizes = [4, 32], strides = [1, 1]} : vector<4x64xf32> to vector<4x32xf32>
    %225 = vector.extract_strided_slice %223 {offsets = [0, 32], sizes = [4, 32], strides = [1, 1]} : vector<4x64xf32> to vector<4x32xf32>
    %226 = vector.extract_strided_slice %213 {offsets = [0, 64], sizes = [4, 32], strides = [1, 1]} : vector<4x96xf32> to vector<4x32xf32>
    %227 = vector.extract_strided_slice %211 {offsets = [0, 64], sizes = [4, 32], strides = [1, 1]} : vector<4x96xf32> to vector<4x32xf32>
    %228 = arith.mulf %224, %227 : vector<4x32xf32>
    %229 = arith.addf %226, %228 : vector<4x32xf32>
    %230 = math.tanh %229 : vector<4x32xf32>
    %cst_50 = arith.constant 1.000000e+00 : f32
    %231 = vector.broadcast %cst_50 : f32 to vector<4x32xf32>
    %232 = arith.subf %231, %225 : vector<4x32xf32>
    %233 = arith.mulf %232, %230 : vector<4x32xf32>
    %234 = arith.mulf %225, %207 : vector<4x32xf32>
    %235 = arith.addf %233, %234 : vector<4x32xf32>
    %236 = arith.truncf %235 : vector<4x32xf32> to vector<4x32xbf16>
    %c0_51 = arith.constant 0 : index
    %c0_52 = arith.constant 0 : index
    %237 = vector.load %arg6[%c0_51, %c0_52] : memref<32x16xbf16, #tpu.memory_space<vmem>>, vector<32x16xbf16>
    %cst_53 = arith.constant dense<0.000000e+00> : vector<4x16xf32>
    %238 = tpu.matmul %236, %237, %cst_53 {dimension_numbers = #tpu.dot_dimension_numbers<[1], [0], [0], [1], [0, 0, 1, 1], [], []>} : vector<4x32xbf16>, vector<32x16xbf16>, vector<4x16xf32> -> vector<4x16xf32>
    %c0_54 = arith.constant 0 : index
    %c0_55 = arith.constant 0 : index
    %239 = vector.load %arg7[%c0_54, %c0_55] : memref<1x16xf32, #tpu.memory_space<vmem>>, vector<1x16xf32>
    %240 = vector.broadcast %239 : vector<1x16xf32> to vector<4x16xf32>
    %241 = arith.addf %238, %240 : vector<4x16xf32>
    %c0_56 = arith.constant 0 : index
    %c0_57 = arith.constant 0 : index
    %242 = vector.load %arg9[%c0_56, %c0_57] : memref<4x1xf32, #tpu.memory_space<vmem>>, vector<4x1xf32>
    %243 = vector.extract_strided_slice %0 {offsets = [0, 4, 0], sizes = [4, 4, 16], strides = [1, 1, 1]} : vector<4x8x16xf32> to vector<4x4x16xf32>
    %244 = vector.extract_strided_slice %243 {offsets = [0, 0, 0], sizes = [4, 1, 16], strides = [1, 1, 1]} : vector<4x4x16xf32> to vector<4x1x16xf32>
    %245 = vector.shape_cast %244 : vector<4x1x16xf32> to vector<4x16xf32>
    %246 = vector.extract_strided_slice %242 {offsets = [0, 0], sizes = [1, 1], strides = [1, 1]} : vector<4x1xf32> to vector<1x1xf32>
    %247 = vector.broadcast %246 : vector<1x1xf32> to vector<4x16xf32>
    %248 = arith.mulf %245, %247 : vector<4x16xf32>
    %249 = vector.extract_strided_slice %243 {offsets = [0, 1, 0], sizes = [4, 1, 16], strides = [1, 1, 1]} : vector<4x4x16xf32> to vector<4x1x16xf32>
    %250 = vector.shape_cast %249 : vector<4x1x16xf32> to vector<4x16xf32>
    %251 = vector.extract_strided_slice %242 {offsets = [1, 0], sizes = [1, 1], strides = [1, 1]} : vector<4x1xf32> to vector<1x1xf32>
    %252 = vector.broadcast %251 : vector<1x1xf32> to vector<4x16xf32>
    %253 = arith.mulf %250, %252 : vector<4x16xf32>
    %254 = arith.addf %248, %253 : vector<4x16xf32>
    %255 = vector.extract_strided_slice %243 {offsets = [0, 2, 0], sizes = [4, 1, 16], strides = [1, 1, 1]} : vector<4x4x16xf32> to vector<4x1x16xf32>
    %256 = vector.shape_cast %255 : vector<4x1x16xf32> to vector<4x16xf32>
    %257 = vector.extract_strided_slice %242 {offsets = [2, 0], sizes = [1, 1], strides = [1, 1]} : vector<4x1xf32> to vector<1x1xf32>
    %258 = vector.broadcast %257 : vector<1x1xf32> to vector<4x16xf32>
    %259 = arith.mulf %256, %258 : vector<4x16xf32>
    %260 = arith.addf %254, %259 : vector<4x16xf32>
    %261 = vector.extract_strided_slice %243 {offsets = [0, 3, 0], sizes = [4, 1, 16], strides = [1, 1, 1]} : vector<4x4x16xf32> to vector<4x1x16xf32>
    %262 = vector.shape_cast %261 : vector<4x1x16xf32> to vector<4x16xf32>
    %263 = vector.extract_strided_slice %242 {offsets = [3, 0], sizes = [1, 1], strides = [1, 1]} : vector<4x1xf32> to vector<1x1xf32>
    %264 = vector.broadcast %263 : vector<1x1xf32> to vector<4x16xf32>
    %265 = arith.mulf %262, %264 : vector<4x16xf32>
    %266 = arith.addf %260, %265 : vector<4x16xf32>
    %267 = arith.truncf %266 : vector<4x16xf32> to vector<4x16xbf16>
    %c0_58 = arith.constant 0 : index
    %c0_59 = arith.constant 0 : index
    %268 = vector.load %arg8[%c0_58, %c0_59] : memref<16x16xbf16, #tpu.memory_space<vmem>>, vector<16x16xbf16>
    %cst_60 = arith.constant dense<0.000000e+00> : vector<4x16xf32>
    %269 = tpu.matmul %267, %268, %cst_60 {dimension_numbers = #tpu.dot_dimension_numbers<[1], [0], [0], [1], [0, 0, 1, 1], [], []>} : vector<4x16xbf16>, vector<16x16xbf16>, vector<4x16xf32> -> vector<4x16xf32>
    %270 = arith.addf %241, %269 : vector<4x16xf32>
    %cst_61 = arith.constant 5.000000e-01 : f32
    %271 = vector.broadcast %cst_61 : f32 to vector<4x16xf32>
    %272 = arith.mulf %271, %270 : vector<4x16xf32>
    %273 = math.tanh %272 : vector<4x16xf32>
    %cst_62 = arith.constant 5.000000e-01 : f32
    %274 = vector.broadcast %cst_62 : f32 to vector<4x16xf32>
    %275 = arith.mulf %274, %273 : vector<4x16xf32>
    %cst_63 = arith.constant 5.000000e-01 : f32
    %276 = vector.broadcast %cst_63 : f32 to vector<4x16xf32>
    %277 = arith.addf %275, %276 : vector<4x16xf32>
    %c0_64 = arith.constant 0 : index
    %c0_65 = arith.constant 0 : index
    %278 = vector.load %arg10[%c0_64, %c0_65] : memref<4x16xf32, #tpu.memory_space<vmem>>, vector<4x16xf32>
    tpu.vector_store %arg10[%c0_64, %c0_65], %277 {strides = array<i32>} : memref<4x16xf32, #tpu.memory_space<vmem>>, vector<4x16xf32>,
    return
  }
  func.func @transform_0(%arg0: i32) -> (i32, i32, i32) {
    %c0_i32 = arith.constant 0 : i32
    %c0_i32_0 = arith.constant 0 : i32
    %c0_i32_1 = arith.constant 0 : i32
    return %arg0, %c0_i32, %c0_i32_0 : i32, i32, i32
  }
  func.func @transform_1(%arg0: i32) -> (i32, i32) {
    %c0_i32 = arith.constant 0 : i32
    %c0_i32_0 = arith.constant 0 : i32
    %c0_i32_1 = arith.constant 0 : i32
    return %c0_i32, %c0_i32_0 : i32, i32
  }
  func.func @transform_2(%arg0: i32) -> (i32, i32) {
    %c0_i32 = arith.constant 0 : i32
    %c0_i32_0 = arith.constant 0 : i32
    %c0_i32_1 = arith.constant 0 : i32
    return %c0_i32, %c0_i32_0 : i32, i32
  }
  func.func @transform_3(%arg0: i32) -> (i32, i32) {
    %c0_i32 = arith.constant 0 : i32
    %c0_i32_0 = arith.constant 0 : i32
    %c0_i32_1 = arith.constant 0 : i32
    return %c0_i32, %c0_i32_0 : i32, i32
  }
  func.func @transform_4(%arg0: i32) -> (i32, i32) {
    %c0_i32 = arith.constant 0 : i32
    %c0_i32_0 = arith.constant 0 : i32
    %c0_i32_1 = arith.constant 0 : i32
    return %c0_i32, %c0_i32_0 : i32, i32
  }
  func.func @transform_5(%arg0: i32) -> (i32, i32) {
    %c0_i32 = arith.constant 0 : i32
    %c0_i32_0 = arith.constant 0 : i32
    %c0_i32_1 = arith.constant 0 : i32
    return %c0_i32, %c0_i32_0 : i32, i32
  }
  func.func @transform_6(%arg0: i32) -> (i32, i32) {
    %c0_i32 = arith.constant 0 : i32
    %c0_i32_0 = arith.constant 0 : i32
    %c0_i32_1 = arith.constant 0 : i32
    return %c0_i32, %c0_i32_0 : i32, i32
  }
  func.func @transform_7(%arg0: i32) -> (i32, i32) {
    %c0_i32 = arith.constant 0 : i32
    %c0_i32_0 = arith.constant 0 : i32
    %c0_i32_1 = arith.constant 0 : i32
    return %c0_i32, %c0_i32_0 : i32, i32
  }
  func.func @transform_8(%arg0: i32) -> (i32, i32) {
    %c0_i32 = arith.constant 0 : i32
    %c0_i32_0 = arith.constant 0 : i32
    %c0_i32_1 = arith.constant 0 : i32
    return %c0_i32, %c0_i32_0 : i32, i32
  }
  func.func @transform_9(%arg0: i32) -> (i32, i32) {
    %c0_i32 = arith.constant 0 : i32
    %c0_i32_0 = arith.constant 0 : i32
    return %arg0, %c0_i32 : i32, i32
  }
}

</mosaic_0001>

<bundles_post_ra>
// kernel: tpu_custom_call.1
= control target key start
LH: loop header
LB: loop body
LE: loop exit
PB: predicated region body
PF: predicated region fallthrough
CT: control target
= control target key end

     0   :  { %14 = vsyncpa [#allocation3], 0  ;;  %s2699_s0 = inlined_call_operand.hbm [shape: f32[4,8,16], index: 0, kind: input, shape index: {}]   ;;  %s2700_s1 = inlined_call_operand.vmem [shape: bf16[16,96], index: 1, kind: input, shape index: {}]   ;;  %s2701_s2 = inlined_call_operand.vmem [shape: bf16[32,96], index: 2, kind: input, shape index: {}]   ;;  %s2702_s3 = inlined_call_operand.vmem [shape: f32[1,96], index: 3, kind: input, shape index: {}]   ;;  %s2703_s4 = inlined_call_operand.vmem [shape: f32[1,96], index: 4, kind: input, shape index: {}]   ;;  %s2704_s5 = inlined_call_operand.vmem [shape: bf16[32,16], index: 5, kind: input, shape index: {}]   ;;  %s2705_s6 = inlined_call_operand.vmem [shape: f32[1,16], index: 6, kind: input, shape index: {}]   ;;  %s2706_s7 = inlined_call_operand.vmem [shape: bf16[16,16], index: 7, kind: input, shape index: {}]   ;;  %s2707_s8 = inlined_call_operand.vmem [shape: f32[4,1], index: 8, kind: input, shape index: {}]   ;;  %s2708_s9 = inlined_call_operand.hbm [shape: f32[4,16], index: 9, kind: output, shape index: {}]  }
   0x1   :  { %15 = vsyncpa [#allocation4], 0  ;;  %s2152_s30 = smov [#allocation2]  }
   0x2   :  { %s21_s10 = sshll.u32 %s2152_s30, 4  ;;  %s22_s10 = int_to_ptr.vmem [resolvable:$true] %s21_s10 }
   0x3   :  { %s2116_s11 = scalar_lea.vmem %s22_s10, 512  ;;  %p2121_p1 = scmp.lt.s32.totalorder %s22_s10, %s22_s10 }
   0x4   :  { %p2117_p0 = scmp.ne.s32.totalorder %s22_s10, %s2116_s11  ;;  %p2122_p2 = scmp.lt.s32.totalorder %s2116_s11, %s2116_s11 }
   0x6   :  { %p2123_p3 = por %p2122_p2, %p2121_p1 }
   0x8   :  { %p2124_p4 = pnand %p2123_p3, %p2117_p0 }
   0xa   :  { %2127 = shalt.err (!%p2124_p4)
}
   0xb   :  { %s2153_s12 = smov 128   ;;  %s2154_s13 = smov 8  }
   0xc   :  { %27 = dma.hbm_to_vmem [thread:$0]  %s2699_s0, 512, %s22_s10, [#allocation3], %s2153_s12, %s2153_s12, %s2154_s13  }
   0xd   :  { %2148 = dma.done.wait [#allocation3], 512  }
   0xe   :  { %2149 = vsyncadd [#allocation3], 4294966784  ;;  %v2155_v0 = vmov 0.0   ;;  %vm2156_vm0 = vmmov 0   ;;  %v1965_v1 = vld [vmem:[%s2700_s1] sm:$0xff]   ;;  %v2223_v2 = vld [vmem:[%s2701_s2 + $0x8] sm:$0xff]  }
   0xf   :  { %1870 = vmatprep.subr.bf16.mxu1 %v2155_v0  ;;  %1874 = vmatprep.mubr.msk.bf16.mxu1 %vm2156_vm0, %v2155_v0  ;;  %v48_v3 = vld [vmem:[#allocation2] sm:$0xff]  ;;  %v49_v4 = vld [vmem:[#allocation2 + $0x8] sm:$0xff]  ;;  %vm81_vm1 = vcmask 130048   ;;  %v50_v5 = vld [vmem:[#allocation2 + $0x10] sm:$0xff]  ;;  %v2157_v10 = vmov 0   ;;  %s2158_s22 = smov 64  }
  0x10   :  { %1864 = vmatprep.subr.bf16.mxu0 %v1965_v1  ;;  %1871 = vmatpush3.bf16.msra.mxu1 %v2223_v2  ;;  %v1830_v6 = vpack.c.bf16 %v49_v4, %v48_v3  ;;  %v51_v7 = vld [vmem:[#allocation2 + $0x18] sm:$0xff]  ;;  %v2230_v9 = vld [vmem:[%s2701_s2] sm:$0xff]   ;;  %vm317_vm2 = vcmask 1041409   ;;  %vm320_vm3 = vcmask 1042434   ;;  %vm323_vm4 = vcmask 1043459   ;;  %s2160_s19 = smov [#allocation5]  }
  0x11   :  { %1865 = vmatpush3.bf16.msra.mxu0 %v1965_v1  ;;  %1872 = vmatprep.subr.bf16.mxu1 %v2155_v0  ;;  %v1831_v8 = vpack.c.bf16 %v51_v7, %v50_v5  ;;  %v2252_v11 = vld [vmem:[%s2703_s4] ss:$0 sm:$0xff]  ;;  %vm160_vm5 = vcmask 261120   ;;  %s1799_s0 = sshll.u32 %s2160_s19, 4  ;;  %vm1791_vm6 = vcmask 125952   ;;  %s1800_s0 = int_to_ptr.vmem [resolvable:$true] %s1799_s0 }
  0x12   :  { %1878 = vmatprep.subr.bf16.mxu0 %v2155_v0  ;;  %1866 = vmatprep.mubr.msk.bf16.mxu0 %vm81_vm1, %v1830_v6  ;;  %v1808_v24 = vld [vmem:[%s2702_s3] ss:$0 sm:$0xff]  ;;  %s2159_s3 = smov 96   ;;  %s2128_s1 = scalar_lea.vmem %s1800_s0, 64 }
  0x13   :  { %p2129_p5 = scmp.ne.s32.totalorder %s1800_s0, %s2128_s1  ;;  %p2133_p6 = scmp.lt.s32.totalorder %s1800_s0, %s1800_s0 }
  0x14   :  { %1867 = vmatmul.mubr.msk.bf16.vlgmr.msra.gmra.mxu0 %vm81_vm1, %v1831_v8  ;;  %1873 = vmatpush3.bf16.msra.mxu1 %v2230_v9  ;;  %p2134_p7 = scmp.lt.s32.totalorder %s2128_s1, %s2128_s1 }
  0x15   :  { %1879 = vmatpush3.bf16.msra.mxu0 %v2223_v2  ;;  %1882 = vmatprep.mubr.msk.bf16.mxu0 %vm2156_vm0, %v2155_v0 }
  0x16   :  { %1880 = vmatprep.subr.bf16.mxu0 %v2155_v0  ;;  %1886 = vmatprep.subr.bf16.mxu1 %v2155_v0  ;;  %p2135_p8 = por %p2134_p7, %p2133_p6 }
  0x17   :  { %1875 = vmatmul.mubr.bf16.vlgmr.msra.gmra.mxu1 %v2157_v10 }
  0x18   :  { %1887 = vmatpush3.bf16.msra.mxu1 %v2223_v2  ;;  %1890 = vmatprep.mubr.msk.bf16.mxu1 %vm2156_vm0, %v2155_v0  ;;  %p2136_p9 = pnand %p2135_p8, %p2129_p5 }
  0x19   :  { %1881 = vmatpush3.bf16.msra.mxu0 %v2230_v9  ;;  %1888 = vmatprep.subr.bf16.mxu1 %v2155_v0 }
  0x1a   :  { %1894 = vmatprep.subr.bf16.mxu0 %v2155_v0 }
  0x1c   :  { %1889 = vmatpush3.bf16.msra.mxu1 %v2230_v9 }
  0x1d   :  { %1902 = vmatprep.subr.bf16.mxu1 %v2155_v0 }
  0xd4   :  { %v1868_v20 = vpop.f32.mrf.mxu0 }
  0xd5   :  { %v2266_v27 = vadd.f32 %v1868_v20, %v1808_v24 }
  0xd6   :  { %v122_v21 = vpop.f32.mrf.mxu0 }
  0xd7   :  { %v198_v12 = vpop.f32.mrf.mxu1  ;;  %v2264_v26 = vadd.f32 %v1808_v24, %v122_v21 }
  0xd8   :  { %v199_v13 = vadd.f32 %v2252_v11, %v198_v12  ;;  %v1869_v22 = vpop.f32.mrf.mxu0 }
  0xd9   :  { %v1876_v14 = vpop.f32.mrf.mxu1  ;;  %v2270_v30 = vadd.f32 %v1869_v22, %v1808_v24 }
  0xda   :  { %232 = vrot.lane.b32.xlu1 %v199_v13, %s2158_s22  ;;  %v205_v15 = vrot.slane %v199_v13, 1  ;;  %v207_v17 = vrot.slane %v199_v13, 3  ;;  %v206_v19 = vrot.slane %v199_v13, 2  ;;  %v125_v23 = vpop.f32.mrf.mxu0  ;;  %v212_v29 = vadd.f32 %v199_v13, %v2264_v26 }
  0xdb   :  { %v201_v16 = vpop.f32.mrf.mxu1  ;;  %v2262_v25 = vadd.f32 %v1808_v24, %v125_v23 }
  0xdc   :  { %234 = vrot.lane.b32.xlu0 %v205_v15, %s2158_s22  ;;  %v214_v32 = vadd.f32 %v206_v19, %v2266_v27  ;;  %v216_v33 = vmul.f32 0.5, %v212_v29  ;;  %v215_v34 = vadd.f32 %v207_v17, %v2270_v30 }
  0xdd   :  { %v1877_v18 = vpop.f32.mrf.mxu1  ;;  %v213_v28 = vadd.f32 %v205_v15, %v2262_v25 }
  0xde   :  { %238 = vrot.lane.b32.xlu1 %v207_v17, %s2158_s22  ;;  %v218_v35 = vmul.f32 0.5, %v214_v32  ;;  %v219_v36 = vmul.f32 0.5, %v215_v34 }
  0xdf   :  { %v217_v31 = vmul.f32 0.5, %v213_v28 }
  0xe0   :  { %236 = vrot.lane.b32.xlu0 %v206_v19, %s2158_s22 }
  0xe1   :  { %1971 = vtanh.f32 %v217_v31 }
  0xe2   :  { %1973 = vtanh.f32 %v216_v33 }
  0xe3   :  { %1975 = vtanh.f32 %v218_v35 }
  0xe4   :  { %1977 = vtanh.f32 %v219_v36 }
  0xee   :  { %v1972_v37 = vpop.eup %1971 }
  0xef   :  { %v1974_v38 = vpop.eup %1973  ;;  %v225_v39 = vmul.f32 0.5, %v1972_v37 }
  0xf0   :  { %v1976_v40 = vpop.eup %1975  ;;  %v224_v41 = vmul.f32 0.5, %v1974_v38 }
  0xf1   :  { %v229_v42 = vadd.f32 0.5, %v225_v39  ;;  %v226_v43 = vmul.f32 0.5, %v1976_v40  ;;  %v1978_v44 = vpop.eup %1977 }
  0xf2   :  { %v228_v48 = vadd.f32 0.5, %v224_v41  ;;  %v227_v49 = vmul.f32 0.5, %v1978_v44 }
  0xf3   :  { %v230_v50 = vadd.f32 0.5, %v226_v43  ;;  %v273_v7 = vsub.f32 1.0, %v229_v42  ;;  %v297_v10 = vmul.f32 0.0, %v229_v42 }
  0xf4   :  { %v231_v55 = vadd.f32 0.5, %v227_v49  ;;  %v272_v16 = vsub.f32 1.0, %v228_v48  ;;  %v296_v21 = vmul.f32 0.0, %v228_v48 }
  0xf5   :  { %v274_v14 = vsub.f32 1.0, %v230_v50  ;;  %v298_v18 = vmul.f32 0.0, %v230_v50 }
  0xf6   :  { %v275_v24 = vsub.f32 1.0, %v231_v55  ;;  %v299_v33 = vmul.f32 0.0, %v231_v55 }
 0x14c   :  { %v233_v45 = vpop.permute.xlu1 %232 }
 0x14d   :  { %v244_v52 = vmul.f32 %v233_v45, %v228_v48 }
 0x14e   :  { %v235_v46 = vpop.permute.xlu0 %234 }
 0x14f   :  { %v245_v47 = vmul.f32 %v235_v46, %v229_v42 }
 0x150   :  { %v239_v54 = vpop.permute.xlu1 %238 }
 0x151   :  { %254 = vrot.lane.b32.xlu0 %v245_v47, %s2158_s22  ;;  %v247_v56 = vmul.f32 %v239_v54, %v231_v55 }
 0x152   :  { %v237_v51 = vpop.permute.xlu0 %236 }
 0x153   :  { %v246_v53 = vmul.f32 %v237_v51, %v230_v50 }
 0x155   :  { %256 = vrot.lane.b32.xlu1 %v246_v53, %s2158_s22  ;;  %252 = vrot.lane.b32.xlu0 %v244_v52, %s2158_s22 }
 0x159   :  { %258 = vrot.lane.b32.xlu1 %v247_v56, %s2158_s22 }
 0x1c3   :  { %v255_v57 = vpop.permute.xlu0 %254 }
 0x1c4   :  { %v265_v58 = vadd.f32 %v255_v57, %v2262_v25 }
 0x1c6   :  { %1979 = vtanh.f32 %v265_v58 }
 0x1c7   :  { %v257_v59 = vpop.permute.xlu1 %256  ;;  %v253_v60 = vpop.permute.xlu0 %252 }
 0x1c8   :  { %v266_v61 = vadd.f32 %v257_v59, %v2266_v27  ;;  %v264_v62 = vadd.f32 %v253_v60, %v2264_v26 }
 0x1ca   :  { %1981 = vtanh.f32 %v266_v61 }
 0x1cb   :  { %1983 = vtanh.f32 %v264_v62  ;;  %v259_v63 = vpop.permute.xlu1 %258 }
 0x1cc   :  { %v267_v1 = vadd.f32 %v259_v63, %v2270_v30 }
 0x1ce   :  { %1985 = vtanh.f32 %v267_v1 }
 0x1d3   :  { %v1980_v3 = vpop.eup %1979 }
 0x1d4   :  { %282 = vrot.lane.b32.xlu0 %v1980_v3, %s2159_s3 }
 0x1d7   :  { %v1982_v4 = vpop.eup %1981 }
 0x1d8   :  { %v1984_v5 = vpop.eup %1983  ;;  %284 = vrot.lane.b32.xlu1 %v1982_v4, %s2159_s3 }
 0x1d9   :  { %280 = vrot.lane.b32.xlu0 %v1984_v5, %s2159_s3 }
 0x1db   :  { %v1986_v6 = vpop.eup %1985 }
 0x1dc   :  { %286 = vrot.lane.b32.xlu1 %v1986_v6, %s2159_s3 }
 0x246   :  { %v283_v8 = vpop.permute.xlu0 %282 }
 0x247   :  { %v293_v12 = vmul.f32 %v283_v8, %v273_v7 }
 0x249   :  { %v2286_v13 = vadd.f32 %v297_v10, %v293_v12 }
 0x24a   :  { %v285_v15 = vpop.permute.xlu1 %284 }
 0x24b   :  { %v305_v17 = vpack.c.bf16 %v2286_v13, %v2286_v13  ;;  %v294_v19 = vmul.f32 %v285_v15, %v274_v14  ;;  %v281_v20 = vpop.permute.xlu0 %280 }
 0x24c   :  { %v292_v22 = vmul.f32 %v281_v20, %v272_v16 }
 0x24d   :  { %v2290_v23 = vadd.f32 %v298_v18, %v294_v19  ;;  %v313_v31 = vunpack.c.l.b16 %v305_v17 }
 0x24e   :  { %v2292_v28 = vadd.f32 %v296_v21, %v292_v22  ;;  %v287_v29 = vpop.permute.xlu1 %286 }
 0x24f   :  { %v306_v32 = vpack.c.bf16 %v2290_v23, %v2290_v23  ;;  %v295_v34 = vmul.f32 %v287_v29, %v275_v24  ;;  %v316_v39 = vrot.slane %v313_v31, 7 }
 0x250   :  { %v304_v35 = vpack.c.bf16 %v2292_v28, %v2292_v28 }
 0x251   :  { %v314_v36 = vunpack.c.l.b16 %v306_v32  ;;  %v2298_v37 = vadd.f32 %v299_v33, %v295_v34 }
 0x252   :  { %v312_v38 = vunpack.c.l.b16 %v304_v35 }
 0x253   :  { %v307_v40 = vpack.c.bf16 %v2298_v37, %v2298_v37  ;;  %v319_v41 = vrot.slane %v314_v36, 6 }
 0x254   :  { %v318_v43 = vsel %vm317_vm2, %v316_v39, %v312_v38 }
 0x255   :  { %v315_v42 = vunpack.c.l.b16 %v307_v40  ;;  %v321_v45 = vsel %vm320_vm3, %v319_v41, %v318_v43 }
 0x257   :  { %v322_v44 = vrot.slane %v315_v42, 5 }
 0x259   :  { %v324_v46 = vsel %vm323_vm4, %v322_v44, %v321_v45  ;;  %v469_v45 = vrot.slane %v2290_v23, 7 }
 0x25a   :  { %v325_v47 = vpack.c.b16 %v324_v46, %v324_v46 }
 0x25c   :  { %326 = vrot.lane.b32.xlu0 %v325_v47, %s2159_s3  ;;  %v467_v47 = vrot.slane %v2292_v28, 7 }
 0x2ce   :  { %v327_v48 = vpop.permute.xlu0 %326 }
 0x2cf   :  { %1883 = vmatmul.mubr.msk.bf16.vlgmr.msra.gmra.mxu0 %vm160_vm5, %v327_v48 }
 0x2d0   :  { %1895 = vmatpush3.bf16.msra.mxu0 %v2223_v2  ;;  %1898 = vmatprep.mubr.msk.bf16.mxu0 %vm2156_vm0, %v2155_v0 }
 0x2d1   :  { %1896 = vmatprep.subr.bf16.mxu0 %v2155_v0 }
 0x2d4   :  { %1897 = vmatpush3.bf16.msra.mxu0 %v2230_v9 }
 0x2d5   :  { %1910 = vmatprep.subr.bf16.mxu0 %v2155_v0 }
 0x38f   :  { %v365_v49 = vpop.f32.mrf.mxu0 }
 0x390   :  { %v366_v50 = vadd.f32 %v2252_v11, %v365_v49 }
 0x391   :  { %v1884_v51 = vpop.f32.mrf.mxu0 }
 0x392   :  { %v373_v52 = vrot.slane %v366_v50, 1  ;;  %v372_v53 = vrot.slane %v366_v50, 7  ;;  %v374_v56 = vrot.slane %v366_v50, 2  ;;  %v380_v60 = vadd.f32 %v366_v50, %v2262_v25 }
 0x393   :  { %v368_v54 = vpop.f32.mrf.mxu0 }
 0x394   :  { %403 = vrot.lane.b32.xlu0 %v373_v52, %s2158_s22  ;;  %399 = vrot.lane.b32.xlu1 %v372_v53, %s2158_s22  ;;  %v381_v57 = vadd.f32 %v373_v52, %v2266_v27  ;;  %v379_v58 = vadd.f32 %v372_v53, %v2264_v26  ;;  %v382_v62 = vadd.f32 %v374_v56, %v2270_v30  ;;  %v384_v63 = vmul.f32 0.5, %v380_v60 }
 0x395   :  { %v1885_v55 = vpop.f32.mrf.mxu0 }
 0x396   :  { %v385_v59 = vmul.f32 0.5, %v381_v57  ;;  %v383_v61 = vmul.f32 0.5, %v379_v58  ;;  %v386_v1 = vmul.f32 0.5, %v382_v62  ;;  %v470_v55 = vrot.slane %v2298_v37, 7 }
 0x397   :  { %v468_v58 = vrot.slane %v2286_v13, 7 }
 0x398   :  { %405 = vrot.lane.b32.xlu0 %v374_v56, %s2158_s22  ;;  %401 = vrot.lane.b32.xlu1 %v366_v50, %s2158_s22  ;;  %1987 = vtanh.f32 %v385_v59 }
 0x399   :  { %1989 = vtanh.f32 %v383_v61 }
 0x39a   :  { %1991 = vtanh.f32 %v384_v63 }
 0x39b   :  { %1993 = vtanh.f32 %v386_v1 }
 0x3a5   :  { %v1988_v3 = vpop.eup %1987 }
 0x3a6   :  { %v1990_v4 = vpop.eup %1989  ;;  %v393_v6 = vmul.f32 0.5, %v1988_v3 }
 0x3a7   :  { %v1992_v5 = vpop.eup %1991  ;;  %v391_v7 = vmul.f32 0.5, %v1990_v4 }
 0x3a8   :  { %v1994_v8 = vpop.eup %1993  ;;  %v397_v10 = vadd.f32 0.5, %v393_v6  ;;  %v392_v15 = vmul.f32 0.5, %v1992_v5 }
 0x3a9   :  { %v395_v12 = vadd.f32 0.5, %v391_v7  ;;  %v394_v14 = vmul.f32 0.5, %v1994_v8 }
 0x3aa   :  { %v396_v21 = vadd.f32 0.5, %v392_v15  ;;  %v441_v46 = vsub.f32 1.0, %v397_v10  ;;  %v477_v50 = vmul.f32 %v469_v45, %v397_v10 }
 0x3ab   :  { %v398_v20 = vadd.f32 0.5, %v394_v14  ;;  %v439_v49 = vsub.f32 1.0, %v395_v12  ;;  %v475_v53 = vmul.f32 %v467_v47, %v395_v12 }
 0x3ac   :  { %v440_v60 = vsub.f32 1.0, %v396_v21  ;;  %v476_v3 = vmul.f32 %v468_v58, %v396_v21 }
 0x3ad   :  { %v442_v57 = vsub.f32 1.0, %v398_v20  ;;  %v478_v61 = vmul.f32 %v470_v55, %v398_v20 }
 0x406   :  { %v404_v16 = vpop.permute.xlu0 %403  ;;  %v400_v17 = vpop.permute.xlu1 %399 }
 0x407   :  { %v413_v18 = vmul.f32 %v404_v16, %v397_v10  ;;  %v411_v19 = vmul.f32 %v400_v17, %v395_v12 }
 0x409   :  { %423 = vrot.lane.b32.xlu0 %v413_v18, %s2158_s22  ;;  %419 = vrot.lane.b32.xlu1 %v411_v19, %s2158_s22 }
 0x40a   :  { %v406_v22 = vpop.permute.xlu0 %405  ;;  %v402_v24 = vpop.permute.xlu1 %401 }
 0x40b   :  { %v414_v29 = vmul.f32 %v406_v22, %v398_v20  ;;  %v412_v31 = vmul.f32 %v402_v24, %v396_v21 }
 0x40d   :  { %425 = vrot.lane.b32.xlu0 %v414_v29, %s2158_s22  ;;  %421 = vrot.lane.b32.xlu1 %v412_v31, %s2158_s22 }
 0x47b   :  { %v424_v32 = vpop.permute.xlu0 %423  ;;  %v420_v33 = vpop.permute.xlu1 %419 }
 0x47c   :  { %v433_v34 = vadd.f32 %v424_v32, %v2266_v27  ;;  %v431_v35 = vadd.f32 %v420_v33, %v2264_v26 }
 0x47e   :  { %1995 = vtanh.f32 %v433_v34 }
 0x47f   :  { %1997 = vtanh.f32 %v431_v35  ;;  %v426_v36 = vpop.permute.xlu0 %425  ;;  %v422_v38 = vpop.permute.xlu1 %421 }
 0x480   :  { %v434_v39 = vadd.f32 %v426_v36, %v2270_v30  ;;  %v432_v40 = vadd.f32 %v422_v38, %v2262_v25 }
 0x482   :  { %1999 = vtanh.f32 %v434_v39 }
 0x483   :  { %2001 = vtanh.f32 %v432_v40 }
 0x48b   :  { %v1996_v41 = vpop.eup %1995 }
 0x48c   :  { %v1998_v42 = vpop.eup %1997  ;;  %451 = vrot.lane.b32.xlu0 %v1996_v41, %s2159_s3 }
 0x48d   :  { %447 = vrot.lane.b32.xlu1 %v1998_v42, %s2159_s3 }
 0x48f   :  { %v2000_v43 = vpop.eup %1999 }
 0x490   :  { %v2002_v44 = vpop.eup %2001  ;;  %453 = vrot.lane.b32.xlu0 %v2000_v43, %s2159_s3 }
 0x491   :  { %449 = vrot.lane.b32.xlu1 %v2002_v44, %s2159_s3 }
 0x4fe   :  { %v452_v48 = vpop.permute.xlu0 %451 }
 0x4ff   :  { %v461_v51 = vmul.f32 %v452_v48, %v441_v46  ;;  %v448_v52 = vpop.permute.xlu1 %447 }
 0x500   :  { %v459_v54 = vmul.f32 %v448_v52, %v439_v49 }
 0x501   :  { %v2337_v56 = vadd.f32 %v477_v50, %v461_v51 }
 0x502   :  { %v2340_v59 = vadd.f32 %v475_v53, %v459_v54  ;;  %v454_v23 = vpop.permute.xlu0 %453 }
 0x503   :  { %v485_v28 = vpack.c.bf16 %v2337_v56, %v2337_v56  ;;  %v462_v62 = vmul.f32 %v454_v23, %v442_v57  ;;  %v450_v63 = vpop.permute.xlu1 %449 }
 0x504   :  { %v483_v1 = vpack.c.bf16 %v2340_v59, %v2340_v59  ;;  %v460_v37 = vmul.f32 %v450_v63, %v440_v60 }
 0x505   :  { %v2346_v4 = vadd.f32 %v478_v61, %v462_v62  ;;  %v493_v13 = vunpack.c.l.b16 %v485_v28 }
 0x506   :  { %v491_v5 = vunpack.c.l.b16 %v483_v1  ;;  %v2348_v6 = vadd.f32 %v476_v3, %v460_v37 }
 0x507   :  { %v486_v7 = vpack.c.bf16 %v2346_v4, %v2346_v4  ;;  %v497_v15 = vrot.slane %v493_v13, 7 }
 0x508   :  { %v484_v8 = vpack.c.bf16 %v2348_v6, %v2348_v6  ;;  %v495_v12 = vrot.slane %v491_v5, 1 }
 0x509   :  { %v494_v10 = vunpack.c.l.b16 %v486_v7 }
 0x50a   :  { %v492_v14 = vunpack.c.l.b16 %v484_v8 }
 0x50b   :  { %v499_v16 = vrot.slane %v494_v10, 6 }
 0x50c   :  { %v496_v17 = vsel %vm317_vm2, %v492_v14, %v495_v12 }
 0x50d   :  { %v498_v18 = vsel %vm320_vm3, %v497_v15, %v496_v17 }
 0x50e   :  { %v500_v19 = vsel %vm323_vm4, %v499_v16, %v498_v18  ;;  %v644_v18 = vrot.slane %v2348_v6, 7 }
 0x50f   :  { %v501_v20 = vpack.c.b16 %v500_v19, %v500_v19 }
 0x511   :  { %502 = vrot.lane.b32.xlu1 %v501_v20, %s2159_s3  ;;  %v643_v20 = vrot.slane %v2340_v59, 7 }
 0x583   :  { %v503_v21 = vpop.permute.xlu1 %502 }
 0x584   :  { %1891 = vmatmul.mubr.msk.bf16.vlgmr.msra.gmra.mxu1 %vm160_vm5, %v503_v21 }
 0x585   :  { %1903 = vmatpush3.bf16.msra.mxu1 %v2223_v2  ;;  %1906 = vmatprep.mubr.msk.bf16.mxu1 %vm2156_vm0, %v2155_v0 }
 0x586   :  { %1904 = vmatprep.subr.bf16.mxu1 %v2155_v0 }
 0x589   :  { %1905 = vmatpush3.bf16.msra.mxu1 %v2230_v9 }
 0x58a   :  { %1918 = vmatprep.subr.bf16.mxu1 %v2155_v0 }
 0x644   :  { %v541_v22 = vpop.f32.mrf.mxu1 }
 0x645   :  { %v542_v24 = vadd.f32 %v2252_v11, %v541_v22 }
 0x646   :  { %v1892_v29 = vpop.f32.mrf.mxu1 }
 0x647   :  { %v549_v31 = vrot.slane %v542_v24, 7  ;;  %v548_v32 = vrot.slane %v542_v24, 6  ;;  %v550_v35 = vrot.slane %v542_v24, 1  ;;  %v557_v40 = vadd.f32 %v542_v24, %v2266_v27 }
 0x648   :  { %v544_v33 = vpop.f32.mrf.mxu1 }
 0x649   :  { %577 = vrot.lane.b32.xlu1 %v549_v31, %s2158_s22  ;;  %575 = vrot.lane.b32.xlu0 %v548_v32, %s2158_s22  ;;  %v556_v36 = vadd.f32 %v549_v31, %v2262_v25  ;;  %v555_v38 = vadd.f32 %v548_v32, %v2264_v26  ;;  %v558_v42 = vadd.f32 %v550_v35, %v2270_v30  ;;  %v561_v43 = vmul.f32 0.5, %v557_v40 }
 0x64a   :  { %v1893_v34 = vpop.f32.mrf.mxu1 }
 0x64b   :  { %v560_v39 = vmul.f32 0.5, %v556_v36  ;;  %v559_v41 = vmul.f32 0.5, %v555_v38  ;;  %v562_v44 = vmul.f32 0.5, %v558_v42  ;;  %v645_v34 = vrot.slane %v2337_v56, 7 }
 0x64c   :  { %v646_v38 = vrot.slane %v2346_v4, 7 }
 0x64d   :  { %579 = vrot.lane.b32.xlu1 %v542_v24, %s2158_s22  ;;  %581 = vrot.lane.b32.xlu0 %v550_v35, %s2158_s22  ;;  %2003 = vtanh.f32 %v560_v39 }
 0x64e   :  { %2005 = vtanh.f32 %v559_v41 }
 0x64f   :  { %2007 = vtanh.f32 %v561_v43 }
 0x650   :  { %2009 = vtanh.f32 %v562_v44 }
 0x65a   :  { %v2004_v45 = vpop.eup %2003 }
 0x65b   :  { %v2006_v46 = vpop.eup %2005  ;;  %v568_v48 = vmul.f32 0.5, %v2004_v45 }
 0x65c   :  { %v2008_v47 = vpop.eup %2007  ;;  %v567_v49 = vmul.f32 0.5, %v2006_v46 }
 0x65d   :  { %v2010_v50 = vpop.eup %2009  ;;  %v572_v51 = vadd.f32 0.5, %v568_v48  ;;  %v569_v53 = vmul.f32 0.5, %v2008_v47 }
 0x65e   :  { %v571_v52 = vadd.f32 0.5, %v567_v49  ;;  %v570_v54 = vmul.f32 0.5, %v2010_v50 }
 0x65f   :  { %v573_v60 = vadd.f32 0.5, %v569_v53  ;;  %v616_v19 = vsub.f32 1.0, %v572_v51  ;;  %v652_v24 = vmul.f32 %v644_v18, %v572_v51 }
 0x660   :  { %v574_v28 = vadd.f32 0.5, %v570_v54  ;;  %v615_v22 = vsub.f32 1.0, %v571_v52  ;;  %v651_v32 = vmul.f32 %v643_v20, %v571_v52 }
 0x661   :  { %v617_v36 = vsub.f32 1.0, %v573_v60  ;;  %v653_v41 = vmul.f32 %v645_v34, %v573_v60 }
 0x662   :  { %v618_v40 = vsub.f32 1.0, %v574_v28  ;;  %v654_v45 = vmul.f32 %v646_v38, %v574_v28 }
 0x6bb   :  { %v578_v55 = vpop.permute.xlu1 %577  ;;  %v576_v57 = vpop.permute.xlu0 %575 }
 0x6bc   :  { %v588_v58 = vmul.f32 %v578_v55, %v572_v51  ;;  %v587_v23 = vmul.f32 %v576_v57, %v571_v52 }
 0x6be   :  { %597 = vrot.lane.b32.xlu1 %v588_v58, %s2158_s22  ;;  %595 = vrot.lane.b32.xlu0 %v587_v23, %s2158_s22 }
 0x6bf   :  { %v580_v61 = vpop.permute.xlu1 %579  ;;  %v582_v62 = vpop.permute.xlu0 %581 }
 0x6c0   :  { %v589_v63 = vmul.f32 %v580_v61, %v573_v60  ;;  %v590_v1 = vmul.f32 %v582_v62, %v574_v28 }
 0x6c2   :  { %599 = vrot.lane.b32.xlu1 %v589_v63, %s2158_s22  ;;  %601 = vrot.lane.b32.xlu0 %v590_v1, %s2158_s22 }
 0x730   :  { %v598_v3 = vpop.permute.xlu1 %597  ;;  %v596_v37 = vpop.permute.xlu0 %595 }
 0x731   :  { %v608_v5 = vadd.f32 %v598_v3, %v2262_v25  ;;  %v607_v13 = vadd.f32 %v596_v37, %v2264_v26 }
 0x733   :  { %2011 = vtanh.f32 %v608_v5 }
 0x734   :  { %2013 = vtanh.f32 %v607_v13  ;;  %v600_v7 = vpop.permute.xlu1 %599  ;;  %v602_v8 = vpop.permute.xlu0 %601 }
 0x735   :  { %v609_v10 = vadd.f32 %v600_v7, %v2266_v27  ;;  %v610_v12 = vadd.f32 %v602_v8, %v2270_v30 }
 0x737   :  { %2015 = vtanh.f32 %v609_v10 }
 0x738   :  { %2017 = vtanh.f32 %v610_v12 }
 0x740   :  { %v2012_v14 = vpop.eup %2011 }
 0x741   :  { %v2014_v15 = vpop.eup %2013  ;;  %625 = vrot.lane.b32.xlu1 %v2012_v14, %s2159_s3 }
 0x742   :  { %623 = vrot.lane.b32.xlu0 %v2014_v15, %s2159_s3 }
 0x744   :  { %v2016_v16 = vpop.eup %2015 }
 0x745   :  { %v2018_v17 = vpop.eup %2017  ;;  %627 = vrot.lane.b32.xlu1 %v2016_v16, %s2159_s3 }
 0x746   :  { %629 = vrot.lane.b32.xlu0 %v2018_v17, %s2159_s3 }
 0x7b3   :  { %v626_v21 = vpop.permute.xlu1 %625 }
 0x7b4   :  { %v636_v29 = vmul.f32 %v626_v21, %v616_v19  ;;  %v624_v31 = vpop.permute.xlu0 %623 }
 0x7b5   :  { %v635_v33 = vmul.f32 %v624_v31, %v615_v22 }
 0x7b6   :  { %v2389_v35 = vadd.f32 %v652_v24, %v636_v29 }
 0x7b7   :  { %v2392_v39 = vadd.f32 %v651_v32, %v635_v33  ;;  %v628_v6 = vpop.permute.xlu1 %627 }
 0x7b8   :  { %v660_v59 = vpack.c.bf16 %v2389_v35, %v2389_v35  ;;  %v637_v42 = vmul.f32 %v628_v6, %v617_v36  ;;  %v630_v43 = vpop.permute.xlu0 %629 }
 0x7b9   :  { %v659_v44 = vpack.c.bf16 %v2392_v39, %v2392_v39  ;;  %v638_v56 = vmul.f32 %v630_v43, %v618_v40 }
 0x7ba   :  { %v668_v46 = vunpack.c.l.b16 %v660_v59  ;;  %v2398_v47 = vadd.f32 %v653_v41, %v637_v42 }
 0x7bb   :  { %v667_v48 = vunpack.c.l.b16 %v659_v44  ;;  %v2400_v4 = vadd.f32 %v654_v45, %v638_v56 }
 0x7bc   :  { %v672_v49 = vrot.slane %v668_v46, 1  ;;  %v661_v50 = vpack.c.bf16 %v2398_v47, %v2398_v47 }
 0x7bd   :  { %v671_v51 = vrot.slane %v667_v48, 2  ;;  %v662_v52 = vpack.c.bf16 %v2400_v4, %v2400_v4 }
 0x7be   :  { %v669_v53 = vunpack.c.l.b16 %v661_v50 }
 0x7bf   :  { %v670_v54 = vunpack.c.l.b16 %v662_v52  ;;  %v673_v55 = vsel %vm317_vm2, %v672_v49, %v671_v51 }
 0x7c0   :  { %v674_v57 = vsel %vm320_vm3, %v669_v53, %v673_v55 }
 0x7c1   :  { %v675_v58 = vrot.slane %v670_v54, 7 }
 0x7c3   :  { %v676_v23 = vsel %vm323_vm4, %v675_v58, %v674_v57  ;;  %v820_v58 = vrot.slane %v2389_v35, 7 }
 0x7c4   :  { %v677_v60 = vpack.c.b16 %v676_v23, %v676_v23 }
 0x7c6   :  { %678 = vrot.lane.b32.xlu0 %v677_v60, %s2159_s3  ;;  %v819_v60 = vrot.slane %v2392_v39, 7 }
 0x838   :  { %v679_v28 = vpop.permute.xlu0 %678 }
 0x839   :  { %1899 = vmatmul.mubr.msk.bf16.vlgmr.msra.gmra.mxu0 %vm160_vm5, %v679_v28 }
 0x83a   :  { %1911 = vmatpush3.bf16.msra.mxu0 %v2223_v2  ;;  %1914 = vmatprep.mubr.msk.bf16.mxu0 %vm2156_vm0, %v2155_v0 }
 0x83b   :  { %1912 = vmatprep.subr.bf16.mxu0 %v2155_v0 }
 0x83e   :  { %1913 = vmatpush3.bf16.msra.mxu0 %v2230_v9 }
 0x83f   :  { %1926 = vmatprep.subr.bf16.mxu0 %v2155_v0 }
 0x8f9   :  { %v717_v61 = vpop.f32.mrf.mxu0 }
 0x8fa   :  { %v718_v62 = vadd.f32 %v2252_v11, %v717_v61 }
 0x8fb   :  { %v1900_v63 = vpop.f32.mrf.mxu0 }
 0x8fc   :  { %v725_v1 = vrot.slane %v718_v62, 6  ;;  %v724_v3 = vrot.slane %v718_v62, 5  ;;  %v726_v13 = vrot.slane %v718_v62, 7  ;;  %v734_v12 = vadd.f32 %v718_v62, %v2270_v30 }
 0x8fd   :  { %v720_v37 = vpop.f32.mrf.mxu0 }
 0x8fe   :  { %753 = vrot.lane.b32.xlu0 %v725_v1, %s2158_s22  ;;  %751 = vrot.lane.b32.xlu1 %v724_v3, %s2158_s22  ;;  %v732_v7 = vadd.f32 %v725_v1, %v2262_v25  ;;  %v731_v8 = vadd.f32 %v724_v3, %v2264_v26  ;;  %v733_v15 = vadd.f32 %v726_v13, %v2266_v27  ;;  %v738_v16 = vmul.f32 0.5, %v734_v12 }
 0x8ff   :  { %v1901_v5 = vpop.f32.mrf.mxu0 }
 0x900   :  { %v736_v10 = vmul.f32 0.5, %v732_v7  ;;  %v735_v14 = vmul.f32 0.5, %v731_v8  ;;  %v737_v17 = vmul.f32 0.5, %v733_v15  ;;  %v822_v5 = vrot.slane %v2400_v4, 7 }
 0x901   :  { %v821_v8 = vrot.slane %v2398_v47, 7 }
 0x902   :  { %757 = vrot.lane.b32.xlu0 %v718_v62, %s2158_s22  ;;  %755 = vrot.lane.b32.xlu1 %v726_v13, %s2158_s22  ;;  %2019 = vtanh.f32 %v736_v10 }
 0x903   :  { %2021 = vtanh.f32 %v735_v14 }
 0x904   :  { %2023 = vtanh.f32 %v738_v16 }
 0x905   :  { %2025 = vtanh.f32 %v737_v17 }
 0x90f   :  { %v2020_v18 = vpop.eup %2019 }
 0x910   :  { %v2022_v19 = vpop.eup %2021  ;;  %v744_v21 = vmul.f32 0.5, %v2020_v18 }
 0x911   :  { %v2024_v20 = vpop.eup %2023  ;;  %v743_v22 = vmul.f32 0.5, %v2022_v19 }
 0x912   :  { %v2026_v24 = vpop.eup %2025  ;;  %v748_v29 = vadd.f32 0.5, %v744_v21  ;;  %v746_v32 = vmul.f32 0.5, %v2024_v20 }
 0x913   :  { %v747_v31 = vadd.f32 0.5, %v743_v22  ;;  %v745_v33 = vmul.f32 0.5, %v2026_v24 }
 0x914   :  { %v750_v40 = vadd.f32 0.5, %v746_v32  ;;  %v792_v23 = vsub.f32 1.0, %v748_v29  ;;  %v828_v62 = vmul.f32 %v820_v58, %v748_v29 }
 0x915   :  { %v749_v59 = vadd.f32 0.5, %v745_v33  ;;  %v791_v61 = vsub.f32 1.0, %v747_v31  ;;  %v827_v3 = vmul.f32 %v819_v60, %v747_v31 }
 0x916   :  { %v794_v7 = vsub.f32 1.0, %v750_v40  ;;  %v830_v14 = vmul.f32 %v822_v5, %v750_v40 }
 0x917   :  { %v793_v12 = vsub.f32 1.0, %v749_v59  ;;  %v829_v18 = vmul.f32 %v821_v8, %v749_v59 }
 0x970   :  { %v754_v34 = vpop.permute.xlu0 %753  ;;  %v752_v36 = vpop.permute.xlu1 %751 }
 0x971   :  { %v764_v38 = vmul.f32 %v754_v34, %v748_v29  ;;  %v763_v6 = vmul.f32 %v752_v36, %v747_v31 }
 0x973   :  { %773 = vrot.lane.b32.xlu0 %v764_v38, %s2158_s22  ;;  %771 = vrot.lane.b32.xlu1 %v763_v6, %s2158_s22 }
 0x974   :  { %v758_v41 = vpop.permute.xlu0 %757  ;;  %v756_v42 = vpop.permute.xlu1 %755 }
 0x975   :  { %v766_v43 = vmul.f32 %v758_v41, %v750_v40  ;;  %v765_v44 = vmul.f32 %v756_v42, %v749_v59 }
 0x977   :  { %777 = vrot.lane.b32.xlu0 %v766_v43, %s2158_s22  ;;  %775 = vrot.lane.b32.xlu1 %v765_v44, %s2158_s22 }
 0x9e5   :  { %v774_v45 = vpop.permute.xlu0 %773  ;;  %v772_v56 = vpop.permute.xlu1 %771 }
 0x9e6   :  { %v784_v46 = vadd.f32 %v774_v45, %v2262_v25  ;;  %v783_v48 = vadd.f32 %v772_v56, %v2264_v26 }
 0x9e8   :  { %2027 = vtanh.f32 %v784_v46 }
 0x9e9   :  { %2029 = vtanh.f32 %v783_v48  ;;  %v778_v49 = vpop.permute.xlu0 %777  ;;  %v776_v50 = vpop.permute.xlu1 %775 }
 0x9ea   :  { %v786_v51 = vadd.f32 %v778_v49, %v2270_v30  ;;  %v785_v52 = vadd.f32 %v776_v50, %v2266_v27 }
 0x9ec   :  { %2031 = vtanh.f32 %v786_v51 }
 0x9ed   :  { %2033 = vtanh.f32 %v785_v52 }
 0x9f5   :  { %v2028_v53 = vpop.eup %2027 }
 0x9f6   :  { %v2030_v54 = vpop.eup %2029  ;;  %801 = vrot.lane.b32.xlu0 %v2028_v53, %s2159_s3 }
 0x9f7   :  { %799 = vrot.lane.b32.xlu1 %v2030_v54, %s2159_s3 }
 0x9f9   :  { %v2032_v55 = vpop.eup %2031 }
 0x9fa   :  { %v2034_v57 = vpop.eup %2033  ;;  %805 = vrot.lane.b32.xlu0 %v2032_v55, %s2159_s3 }
 0x9fb   :  { %803 = vrot.lane.b32.xlu1 %v2034_v57, %s2159_s3 }
 0xa68   :  { %v802_v28 = vpop.permute.xlu0 %801 }
 0xa69   :  { %v812_v63 = vmul.f32 %v802_v28, %v792_v23  ;;  %v800_v1 = vpop.permute.xlu1 %799 }
 0xa6a   :  { %v811_v37 = vmul.f32 %v800_v1, %v791_v61 }
 0xa6b   :  { %v2441_v13 = vadd.f32 %v828_v62, %v812_v63 }
 0xa6c   :  { %v2444_v10 = vadd.f32 %v827_v3, %v811_v37  ;;  %v806_v35 = vpop.permute.xlu0 %805 }
 0xa6d   :  { %v836_v39 = vpack.c.bf16 %v2441_v13, %v2441_v13  ;;  %v814_v15 = vmul.f32 %v806_v35, %v794_v7  ;;  %v804_v16 = vpop.permute.xlu1 %803 }
 0xa6e   :  { %v835_v17 = vpack.c.bf16 %v2444_v10, %v2444_v10  ;;  %v813_v4 = vmul.f32 %v804_v16, %v793_v12 }
 0xa6f   :  { %v844_v19 = vunpack.c.l.b16 %v836_v39  ;;  %v2450_v20 = vadd.f32 %v830_v14, %v814_v15 }
 0xa70   :  { %v843_v21 = vunpack.c.l.b16 %v835_v17  ;;  %v2452_v47 = vadd.f32 %v829_v18, %v813_v4 }
 0xa71   :  { %v848_v22 = vrot.slane %v844_v19, 2  ;;  %v838_v31 = vpack.c.bf16 %v2450_v20, %v2450_v20 }
 0xa72   :  { %v847_v24 = vrot.slane %v843_v21, 3  ;;  %v837_v29 = vpack.c.bf16 %v2452_v47, %v2452_v47 }
 0xa73   :  { %v846_v36 = vunpack.c.l.b16 %v838_v31 }
 0xa74   :  { %v845_v32 = vunpack.c.l.b16 %v837_v29  ;;  %v849_v33 = vsel %vm317_vm2, %v848_v22, %v847_v24 }
 0xa76   :  { %v850_v34 = vrot.slane %v845_v32, 1 }
 0xa78   :  { %v851_v38 = vsel %vm320_vm3, %v850_v34, %v849_v33  ;;  %v997_v34 = vrot.slane %v2441_v13, 7 }
 0xa79   :  { %v852_v6 = vsel %vm323_vm4, %v846_v36, %v851_v38  ;;  %v996_v38 = vrot.slane %v2444_v10, 7 }
 0xa7a   :  { %v853_v40 = vpack.c.b16 %v852_v6, %v852_v6 }
 0xa7c   :  { %854 = vrot.lane.b32.xlu1 %v853_v40, %s2159_s3 }
 0xaee   :  { %v855_v59 = vpop.permute.xlu1 %854 }
 0xaef   :  { %1907 = vmatmul.mubr.msk.bf16.vlgmr.msra.gmra.mxu1 %vm160_vm5, %v855_v59 }
 0xaf0   :  { %1919 = vmatpush3.bf16.msra.mxu1 %v2223_v2  ;;  %1922 = vmatprep.mubr.msk.bf16.mxu1 %vm2156_vm0, %v2155_v0 }
 0xaf1   :  { %1920 = vmatprep.subr.bf16.mxu1 %v2155_v0 }
 0xaf4   :  { %1921 = vmatpush3.bf16.msra.mxu1 %v2230_v9 }
 0xaf5   :  { %1934 = vmatprep.subr.bf16.mxu1 %v2155_v0 }
 0xbaf   :  { %v893_v41 = vpop.f32.mrf.mxu1 }
 0xbb0   :  { %v894_v42 = vadd.f32 %v2252_v11, %v893_v41 }
 0xbb1   :  { %v1908_v43 = vpop.f32.mrf.mxu1 }
 0xbb2   :  { %v901_v44 = vrot.slane %v894_v42, 5  ;;  %v900_v45 = vrot.slane %v894_v42, 4  ;;  %v903_v46 = vrot.slane %v894_v42, 7  ;;  %v902_v48 = vrot.slane %v894_v42, 6 }
 0xbb3   :  { %v896_v56 = vpop.f32.mrf.mxu1 }
 0xbb4   :  { %930 = vrot.lane.b32.xlu1 %v901_v44, %s2158_s22  ;;  %928 = vrot.lane.b32.xlu0 %v900_v45, %s2158_s22  ;;  %v909_v9 = vadd.f32 %v901_v44, %v2262_v25  ;;  %v908_v49 = vadd.f32 %v900_v45, %v2264_v26  ;;  %v911_v50 = vadd.f32 %v903_v46, %v2270_v30  ;;  %v999_v45 = vrot.slane %v2450_v20, 7 }
 0xbb5   :  { %v1909_v2 = vpop.f32.mrf.mxu1  ;;  %v910_v52 = vadd.f32 %v902_v48, %v2266_v27 }
 0xbb6   :  { %v913_v11 = vmul.f32 0.5, %v909_v9  ;;  %v912_v51 = vmul.f32 0.5, %v908_v49  ;;  %v915_v53 = vmul.f32 0.5, %v911_v50 }
 0xbb7   :  { %v914_v54 = vmul.f32 0.5, %v910_v52 }
 0xbb8   :  { %934 = vrot.lane.b32.xlu1 %v903_v46, %s2158_s22  ;;  %932 = vrot.lane.b32.xlu0 %v902_v48, %s2158_s22  ;;  %2035 = vtanh.f32 %v913_v11  ;;  %v998_v46 = vrot.slane %v2452_v47, 7 }
 0xbb9   :  { %2037 = vtanh.f32 %v912_v51 }
 0xbba   :  { %2039 = vtanh.f32 %v915_v53 }
 0xbbb   :  { %2041 = vtanh.f32 %v914_v54 }
 0xbc5   :  { %v2036_v55 = vpop.eup %2035 }
 0xbc6   :  { %v2038_v57 = vpop.eup %2037  ;;  %v921_v23 = vmul.f32 0.5, %v2036_v55 }
 0xbc7   :  { %v2040_v58 = vpop.eup %2039  ;;  %v920_v60 = vmul.f32 0.5, %v2038_v57 }
 0xbc8   :  { %v2042_v28 = vpop.eup %2041  ;;  %v925_v61 = vadd.f32 0.5, %v921_v23  ;;  %v923_v63 = vmul.f32 0.5, %v2040_v58 }
 0xbc9   :  { %v924_v62 = vadd.f32 0.5, %v920_v60  ;;  %v922_v1 = vmul.f32 0.5, %v2042_v28 }
 0xbca   :  { %v927_v8 = vadd.f32 0.5, %v923_v63  ;;  %v969_v36 = vsub.f32 1.0, %v925_v61  ;;  %v1005_v59 = vmul.f32 %v997_v34, %v925_v61 }
 0xbcb   :  { %v926_v35 = vadd.f32 0.5, %v922_v1  ;;  %v968_v40 = vsub.f32 1.0, %v924_v62  ;;  %v1004_v43 = vmul.f32 %v996_v38, %v924_v62 }
 0xbcc   :  { %v971_v2 = vsub.f32 1.0, %v927_v8  ;;  %v1007_v49 = vmul.f32 %v999_v45, %v927_v8 }
 0xbcd   :  { %v970_v9 = vsub.f32 1.0, %v926_v35  ;;  %v1006_v52 = vmul.f32 %v998_v46, %v926_v35 }
 0xc26   :  { %v931_v3 = vpop.permute.xlu1 %930  ;;  %v929_v37 = vpop.permute.xlu0 %928 }
 0xc27   :  { %v941_v5 = vmul.f32 %v931_v3, %v925_v61  ;;  %v940_v7 = vmul.f32 %v929_v37, %v924_v62 }
 0xc29   :  { %950 = vrot.lane.b32.xlu1 %v941_v5, %s2158_s22  ;;  %948 = vrot.lane.b32.xlu0 %v940_v7, %s2158_s22 }
 0xc2a   :  { %v935_v12 = vpop.permute.xlu1 %934  ;;  %v933_v39 = vpop.permute.xlu0 %932 }
 0xc2b   :  { %v943_v14 = vmul.f32 %v935_v12, %v927_v8  ;;  %v942_v15 = vmul.f32 %v933_v39, %v926_v35  ;;  %v2101_v8 = vld [vmem:[%s2701_s2 + $0x8] sm:$0xff]   ;;  %v2102_v35 = vld [vmem:[%s2701_s2] sm:$0xff]  }
 0xc2c   :  { %v2528_v39 = vld [vmem:[%s2703_s4] ss:$0 sm:$0xff] }
 0xc2d   :  { %954 = vrot.lane.b32.xlu1 %v943_v14, %s2158_s22  ;;  %952 = vrot.lane.b32.xlu0 %v942_v15, %s2158_s22 }
 0xc9b   :  { %v951_v16 = vpop.permute.xlu1 %950  ;;  %v949_v17 = vpop.permute.xlu0 %948 }
 0xc9c   :  { %v961_v18 = vadd.f32 %v951_v16, %v2262_v25  ;;  %v960_v4 = vadd.f32 %v949_v17, %v2264_v26 }
 0xc9e   :  { %2043 = vtanh.f32 %v961_v18 }
 0xc9f   :  { %2045 = vtanh.f32 %v960_v4  ;;  %v955_v19 = vpop.permute.xlu1 %954  ;;  %v953_v21 = vpop.permute.xlu0 %952 }
 0xca0   :  { %v963_v22 = vadd.f32 %v955_v19, %v2270_v30  ;;  %v962_v24 = vadd.f32 %v953_v21, %v2266_v27 }
 0xca2   :  { %2047 = vtanh.f32 %v963_v22 }
 0xca3   :  { %2049 = vtanh.f32 %v962_v24 }
 0xcab   :  { %v2044_v29 = vpop.eup %2043 }
 0xcac   :  { %v2046_v31 = vpop.eup %2045  ;;  %978 = vrot.lane.b32.xlu1 %v2044_v29, %s2159_s3 }
 0xcad   :  { %976 = vrot.lane.b32.xlu0 %v2046_v31, %s2159_s3 }
 0xcaf   :  { %v2048_v32 = vpop.eup %2047 }
 0xcb0   :  { %v2050_v33 = vpop.eup %2049  ;;  %982 = vrot.lane.b32.xlu1 %v2048_v32, %s2159_s3 }
 0xcb1   :  { %980 = vrot.lane.b32.xlu0 %v2050_v33, %s2159_s3 }
 0xd1e   :  { %v979_v6 = vpop.permute.xlu1 %978 }
 0xd1f   :  { %v989_v41 = vmul.f32 %v979_v6, %v969_v36  ;;  %v977_v42 = vpop.permute.xlu0 %976 }
 0xd20   :  { %v988_v44 = vmul.f32 %v977_v42, %v968_v40 }
 0xd21   :  { %v2493_v56 = vadd.f32 %v1005_v59, %v989_v41 }
 0xd22   :  { %v2496_v48 = vadd.f32 %v1004_v43, %v988_v44  ;;  %v983_v13 = vpop.permute.xlu1 %982 }
 0xd23   :  { %v1013_v10 = vpack.c.bf16 %v2493_v56, %v2493_v56  ;;  %v991_v11 = vmul.f32 %v983_v13, %v971_v2  ;;  %v981_v50 = vpop.permute.xlu0 %980 }
 0xd24   :  { %v1012_v51 = vpack.c.bf16 %v2496_v48, %v2496_v48  ;;  %v990_v20 = vmul.f32 %v981_v50, %v970_v9 }
 0xd25   :  { %v1021_v53 = vunpack.c.l.b16 %v1013_v10  ;;  %v2502_v54 = vadd.f32 %v1007_v49, %v991_v11 }
 0xd26   :  { %v1020_v55 = vunpack.c.l.b16 %v1012_v51  ;;  %v2504_v47 = vadd.f32 %v1006_v52, %v990_v20 }
 0xd27   :  { %v1025_v57 = vrot.slane %v1021_v53, 3  ;;  %v1015_v58 = vpack.c.bf16 %v2502_v54, %v2502_v54 }
 0xd28   :  { %v1024_v23 = vrot.slane %v1020_v55, 4  ;;  %v1014_v60 = vpack.c.bf16 %v2504_v47, %v2504_v47 }
 0xd29   :  { %v1023_v28 = vunpack.c.l.b16 %v1015_v58 }
 0xd2a   :  { %v1022_v61 = vunpack.c.l.b16 %v1014_v60  ;;  %v1026_v62 = vsel %vm317_vm2, %v1025_v57, %v1024_v23 }
 0xd2b   :  { %v1029_v63 = vrot.slane %v1023_v28, 1 }
 0xd2c   :  { %v1027_v1 = vrot.slane %v1022_v61, 2 }
 0xd2e   :  { %v1028_v3 = vsel %vm320_vm3, %v1027_v1, %v1026_v62 }
 0xd2f   :  { %v1030_v37 = vsel %vm323_vm4, %v1029_v63, %v1028_v3 }
 0xd30   :  { %v1031_v5 = vpack.c.b16 %v1030_v37, %v1030_v37  ;;  %v1175_v37 = vrot.slane %v2493_v56, 7 }
 0xd32   :  { %1032 = vrot.lane.b32.xlu0 %v1031_v5, %s2159_s3 }
 0xda4   :  { %v1033_v7 = vpop.permute.xlu0 %1032 }
 0xda5   :  { %1915 = vmatmul.mubr.msk.bf16.vlgmr.msra.gmra.mxu0 %vm160_vm5, %v1033_v7  ;;  %v1174_v7 = vrot.slane %v2496_v48, 7 }
 0xda6   :  { %1927 = vmatpush3.bf16.msra.mxu0 %v2101_v8  ;;  %1930 = vmatprep.mubr.msk.bf16.mxu0 %vm2156_vm0, %v2155_v0 }
 0xda7   :  { %1928 = vmatprep.subr.bf16.mxu0 %v2155_v0 }
 0xdaa   :  { %1929 = vmatpush3.bf16.msra.mxu0 %v2102_v35 }
 0xdab   :  { %1942 = vmatprep.subr.bf16.mxu0 %v2155_v0 }
 0xe65   :  { %v1071_v12 = vpop.f32.mrf.mxu0 }
 0xe66   :  { %v1072_v14 = vadd.f32 %v2528_v39, %v1071_v12 }
 0xe67   :  { %v1916_v15 = vpop.f32.mrf.mxu0 }
 0xe68   :  { %v1079_v16 = vrot.slane %v1072_v14, 4  ;;  %v1078_v17 = vrot.slane %v1072_v14, 3  ;;  %v1081_v19 = vrot.slane %v1072_v14, 6  ;;  %v1080_v21 = vrot.slane %v1072_v14, 5 }
 0xe69   :  { %v1074_v18 = vpop.f32.mrf.mxu0 }
 0xe6a   :  { %1108 = vrot.lane.b32.xlu0 %v1079_v16, %s2158_s22  ;;  %1106 = vrot.lane.b32.xlu1 %v1078_v17, %s2158_s22  ;;  %v1087_v22 = vadd.f32 %v1079_v16, %v2262_v25  ;;  %v1086_v24 = vadd.f32 %v1078_v17, %v2264_v26  ;;  %v1089_v31 = vadd.f32 %v1081_v19, %v2270_v30  ;;  %v1177_v18 = vrot.slane %v2502_v54, 7 }
 0xe6b   :  { %v1917_v4 = vpop.f32.mrf.mxu0  ;;  %v1088_v33 = vadd.f32 %v1080_v21, %v2266_v27 }
 0xe6c   :  { %v1091_v29 = vmul.f32 0.5, %v1087_v22  ;;  %v1090_v32 = vmul.f32 0.5, %v1086_v24  ;;  %v1093_v34 = vmul.f32 0.5, %v1089_v31 }
 0xe6d   :  { %v1092_v36 = vmul.f32 0.5, %v1088_v33 }
 0xe6e   :  { %1112 = vrot.lane.b32.xlu0 %v1081_v19, %s2158_s22  ;;  %1110 = vrot.lane.b32.xlu1 %v1080_v21, %s2158_s22  ;;  %2051 = vtanh.f32 %v1091_v29  ;;  %v1176_v21 = vrot.slane %v2504_v47, 7 }
 0xe6f   :  { %2053 = vtanh.f32 %v1090_v32 }
 0xe70   :  { %2055 = vtanh.f32 %v1093_v34 }
 0xe71   :  { %2057 = vtanh.f32 %v1092_v36 }
 0xe7b   :  { %v2052_v38 = vpop.eup %2051 }
 0xe7c   :  { %v2054_v6 = vpop.eup %2053  ;;  %v1099_v59 = vmul.f32 0.5, %v2052_v38 }
 0xe7d   :  { %v2056_v40 = vpop.eup %2055  ;;  %v1098_v41 = vmul.f32 0.5, %v2054_v6 }
 0xe7e   :  { %v2058_v42 = vpop.eup %2057  ;;  %v1103_v43 = vadd.f32 0.5, %v1099_v59  ;;  %v1101_v45 = vmul.f32 0.5, %v2056_v40 }
 0xe7f   :  { %v1102_v44 = vadd.f32 0.5, %v1098_v41  ;;  %v1100_v2 = vmul.f32 0.5, %v2058_v42 }
 0xe80   :  { %v1105_v49 = vadd.f32 0.5, %v1101_v45  ;;  %v1147_v5 = vsub.f32 1.0, %v1103_v43  ;;  %v1183_v12 = vmul.f32 %v1175_v37, %v1103_v43 }
 0xe81   :  { %v1104_v11 = vadd.f32 0.5, %v1100_v2  ;;  %v1146_v35 = vsub.f32 1.0, %v1102_v44  ;;  %v1182_v16 = vmul.f32 %v1174_v7, %v1102_v44 }
 0xe82   :  { %v1149_v19 = vsub.f32 1.0, %v1105_v49  ;;  %v1185_v29 = vmul.f32 %v1177_v18, %v1105_v49 }
 0xe83   :  { %v1148_v24 = vsub.f32 1.0, %v1104_v11  ;;  %v1184_v34 = vmul.f32 %v1176_v21, %v1104_v11 }
 0xedc   :  { %v1109_v46 = vpop.permute.xlu0 %1108  ;;  %v1107_v13 = vpop.permute.xlu1 %1106 }
 0xedd   :  { %v1119_v9 = vmul.f32 %v1109_v46, %v1103_v43  ;;  %v1118_v10 = vmul.f32 %v1107_v13, %v1102_v44 }
 0xedf   :  { %1128 = vrot.lane.b32.xlu0 %v1119_v9, %s2158_s22  ;;  %1126 = vrot.lane.b32.xlu1 %v1118_v10, %s2158_s22 }
 0xee0   :  { %v1113_v50 = vpop.permute.xlu0 %1112  ;;  %v1111_v51 = vpop.permute.xlu1 %1110 }
 0xee1   :  { %v1121_v52 = vmul.f32 %v1113_v50, %v1105_v49  ;;  %v1120_v20 = vmul.f32 %v1111_v51, %v1104_v11 }
 0xee3   :  { %1132 = vrot.lane.b32.xlu0 %v1121_v52, %s2158_s22  ;;  %1130 = vrot.lane.b32.xlu1 %v1120_v20, %s2158_s22 }
 0xf51   :  { %v1129_v53 = vpop.permute.xlu0 %1128  ;;  %v1127_v55 = vpop.permute.xlu1 %1126 }
 0xf52   :  { %v1139_v57 = vadd.f32 %v1129_v53, %v2262_v25  ;;  %v1138_v58 = vadd.f32 %v1127_v55, %v2264_v26 }
 0xf54   :  { %2059 = vtanh.f32 %v1139_v57 }
 0xf55   :  { %2061 = vtanh.f32 %v1138_v58  ;;  %v1133_v23 = vpop.permute.xlu0 %1132  ;;  %v1131_v60 = vpop.permute.xlu1 %1130 }
 0xf56   :  { %v1141_v28 = vadd.f32 %v1133_v23, %v2270_v30  ;;  %v1140_v61 = vadd.f32 %v1131_v60, %v2266_v27 }
 0xf58   :  { %2063 = vtanh.f32 %v1141_v28 }
 0xf59   :  { %2065 = vtanh.f32 %v1140_v61 }
 0xf61   :  { %v2060_v62 = vpop.eup %2059 }
 0xf62   :  { %v2062_v63 = vpop.eup %2061  ;;  %1156 = vrot.lane.b32.xlu0 %v2060_v62, %s2159_s3 }
 0xf63   :  { %1154 = vrot.lane.b32.xlu1 %v2062_v63, %s2159_s3 }
 0xf65   :  { %v2064_v1 = vpop.eup %2063 }
 0xf66   :  { %v2066_v3 = vpop.eup %2065  ;;  %1160 = vrot.lane.b32.xlu0 %v2064_v1, %s2159_s3 }
 0xf67   :  { %1158 = vrot.lane.b32.xlu1 %v2066_v3, %s2159_s3 }
 0xfd4   :  { %v1157_v8 = vpop.permute.xlu0 %1156 }
 0xfd5   :  { %v1167_v14 = vmul.f32 %v1157_v8, %v1147_v5  ;;  %v1155_v15 = vpop.permute.xlu1 %1154 }
 0xfd6   :  { %v1166_v17 = vmul.f32 %v1155_v15, %v1146_v35 }
 0xfd7   :  { %v2554_v4 = vadd.f32 %v1183_v12, %v1167_v14 }
 0xfd8   :  { %v2557_v22 = vadd.f32 %v1182_v16, %v1166_v17  ;;  %v1161_v56 = vpop.permute.xlu0 %1160 }
 0xfd9   :  { %v1191_v48 = vpack.c.bf16 %v2554_v4, %v2554_v4  ;;  %v1169_v31 = vmul.f32 %v1161_v56, %v1149_v19  ;;  %v1159_v32 = vpop.permute.xlu1 %1158 }
 0xfda   :  { %v1190_v33 = vpack.c.bf16 %v2557_v22, %v2557_v22  ;;  %v1168_v54 = vmul.f32 %v1159_v32, %v1148_v24 }
 0xfdb   :  { %v1199_v36 = vunpack.c.l.b16 %v1191_v48  ;;  %v2563_v38 = vadd.f32 %v1185_v29, %v1169_v31 }
 0xfdc   :  { %v1198_v6 = vunpack.c.l.b16 %v1190_v33  ;;  %v2565_v47 = vadd.f32 %v1184_v34, %v1168_v54 }
 0xfdd   :  { %v1203_v40 = vrot.slane %v1199_v36, 4  ;;  %v1193_v59 = vpack.c.bf16 %v2563_v38, %v2563_v38 }
 0xfde   :  { %v1202_v41 = vrot.slane %v1198_v6, 5  ;;  %v1192_v42 = vpack.c.bf16 %v2565_v47, %v2565_v47 }
 0xfdf   :  { %v1201_v43 = vunpack.c.l.b16 %v1193_v59 }
 0xfe0   :  { %v1200_v44 = vunpack.c.l.b16 %v1192_v42  ;;  %v1204_v45 = vsel %vm317_vm2, %v1203_v40, %v1202_v41 }
 0xfe1   :  { %v1207_v2 = vrot.slane %v1201_v43, 2 }
 0xfe2   :  { %v1205_v46 = vrot.slane %v1200_v44, 3 }
 0xfe4   :  { %v1206_v13 = vsel %vm320_vm3, %v1205_v46, %v1204_v45  ;;  %v1353_v46 = vrot.slane %v2554_v4, 7 }
 0xfe5   :  { %v1208_v9 = vsel %vm323_vm4, %v1207_v2, %v1206_v13 }
 0xfe6   :  { %v1209_v10 = vpack.c.b16 %v1208_v9, %v1208_v9  ;;  %v1352_v9 = vrot.slane %v2557_v22, 7 }
 0xfe8   :  { %1210 = vrot.lane.b32.xlu1 %v1209_v10, %s2159_s3 }
0x105a   :  { %v1211_v49 = vpop.permute.xlu1 %1210 }
0x105b   :  { %1923 = vmatmul.mubr.msk.bf16.vlgmr.msra.gmra.mxu1 %vm160_vm5, %v1211_v49 }
0x105c   :  { %1938 = vmatprep.mubr.msk.bf16.mxu1 %vm2156_vm0, %v2155_v0 }
0x111b   :  { %v1249_v11 = vpop.f32.mrf.mxu1 }
0x111c   :  { %v1250_v50 = vadd.f32 %v2528_v39, %v1249_v11 }
0x111d   :  { %v1924_v51 = vpop.f32.mrf.mxu1 }
0x111e   :  { %v1257_v52 = vrot.slane %v1250_v50, 3  ;;  %v1256_v20 = vrot.slane %v1250_v50, 2  ;;  %v1259_v57 = vrot.slane %v1250_v50, 5  ;;  %v1258_v58 = vrot.slane %v1250_v50, 4 }
0x111f   :  { %v1252_v53 = vpop.f32.mrf.mxu1 }
0x1120   :  { %1286 = vrot.lane.b32.xlu1 %v1257_v52, %s2158_s22  ;;  %1284 = vrot.lane.b32.xlu0 %v1256_v20, %s2158_s22  ;;  %v1265_v23 = vadd.f32 %v1257_v52, %v2262_v25  ;;  %v1264_v60 = vadd.f32 %v1256_v20, %v2264_v26  ;;  %v1267_v61 = vadd.f32 %v1259_v57, %v2270_v30  ;;  %v1355_v53 = vrot.slane %v2563_v38, 7 }
0x1121   :  { %v1925_v55 = vpop.f32.mrf.mxu1  ;;  %v1266_v63 = vadd.f32 %v1258_v58, %v2266_v27 }
0x1122   :  { %v1269_v28 = vmul.f32 0.5, %v1265_v23  ;;  %v1268_v62 = vmul.f32 0.5, %v1264_v60  ;;  %v1271_v1 = vmul.f32 0.5, %v1267_v61 }
0x1123   :  { %v1270_v3 = vmul.f32 0.5, %v1266_v63 }
0x1124   :  { %1290 = vrot.lane.b32.xlu1 %v1259_v57, %s2158_s22  ;;  %1288 = vrot.lane.b32.xlu0 %v1258_v58, %s2158_s22  ;;  %2067 = vtanh.f32 %v1269_v28  ;;  %v1354_v58 = vrot.slane %v2565_v47, 7 }
0x1125   :  { %2069 = vtanh.f32 %v1268_v62 }
0x1126   :  { %2071 = vtanh.f32 %v1271_v1 }
0x1127   :  { %2073 = vtanh.f32 %v1270_v3 }
0x1131   :  { %v2068_v37 = vpop.eup %2067 }
0x1132   :  { %v2070_v5 = vpop.eup %2069  ;;  %v1277_v8 = vmul.f32 0.5, %v2068_v37 }
0x1133   :  { %v2072_v7 = vpop.eup %2071  ;;  %v1276_v35 = vmul.f32 0.5, %v2070_v5 }
0x1134   :  { %v2074_v12 = vpop.eup %2073  ;;  %v1281_v14 = vadd.f32 0.5, %v1277_v8  ;;  %v1279_v16 = vmul.f32 0.5, %v2072_v7 }
0x1135   :  { %v1280_v15 = vadd.f32 0.5, %v1276_v35  ;;  %v1278_v17 = vmul.f32 0.5, %v2074_v12 }
0x1136   :  { %v1283_v24 = vadd.f32 0.5, %v1279_v16  ;;  %v1325_v13 = vsub.f32 1.0, %v1281_v14  ;;  %v1361_v11 = vmul.f32 %v1353_v46, %v1281_v14 }
0x1137   :  { %v1282_v48 = vadd.f32 0.5, %v1278_v17  ;;  %v1324_v49 = vsub.f32 1.0, %v1280_v15  ;;  %v1360_v52 = vmul.f32 %v1352_v9, %v1280_v15 }
0x1138   :  { %v1327_v57 = vsub.f32 1.0, %v1283_v24  ;;  %v1363_v28 = vmul.f32 %v1355_v53, %v1283_v24 }
0x1139   :  { %v1326_v60 = vsub.f32 1.0, %v1282_v48  ;;  %v1362_v1 = vmul.f32 %v1354_v58, %v1282_v48 }
0x1192   :  { %v1287_v18 = vpop.permute.xlu1 %1286  ;;  %v1285_v19 = vpop.permute.xlu0 %1284 }
0x1193   :  { %v1297_v21 = vmul.f32 %v1287_v18, %v1281_v14  ;;  %v1296_v56 = vmul.f32 %v1285_v19, %v1280_v15 }
0x1195   :  { %1306 = vrot.lane.b32.xlu1 %v1297_v21, %s2158_s22  ;;  %1304 = vrot.lane.b32.xlu0 %v1296_v56, %s2158_s22 }
0x1196   :  { %v1291_v29 = vpop.permute.xlu1 %1290  ;;  %v1289_v31 = vpop.permute.xlu0 %1288 }
0x1197   :  { %v1299_v32 = vmul.f32 %v1291_v29, %v1283_v24  ;;  %v1298_v33 = vmul.f32 %v1289_v31, %v1282_v48 }
0x1199   :  { %1310 = vrot.lane.b32.xlu1 %v1299_v32, %s2158_s22  ;;  %1308 = vrot.lane.b32.xlu0 %v1298_v33, %s2158_s22 }
0x1207   :  { %v1307_v34 = vpop.permute.xlu1 %1306  ;;  %v1305_v54 = vpop.permute.xlu0 %1304 }
0x1208   :  { %v1317_v36 = vadd.f32 %v1307_v34, %v2262_v25  ;;  %v1316_v6 = vadd.f32 %v1305_v54, %v2264_v26 }
0x120a   :  { %2075 = vtanh.f32 %v1317_v36 }
0x120b   :  { %2077 = vtanh.f32 %v1316_v6  ;;  %v1311_v40 = vpop.permute.xlu1 %1310  ;;  %v1309_v59 = vpop.permute.xlu0 %1308 }
0x120c   :  { %v1319_v41 = vadd.f32 %v1311_v40, %v2270_v30  ;;  %v1318_v42 = vadd.f32 %v1309_v59, %v2266_v27 }
0x120e   :  { %2079 = vtanh.f32 %v1319_v41 }
0x120f   :  { %2081 = vtanh.f32 %v1318_v42 }
0x1217   :  { %v2076_v43 = vpop.eup %2075 }
0x1218   :  { %v2078_v44 = vpop.eup %2077  ;;  %1334 = vrot.lane.b32.xlu1 %v2076_v43, %s2159_s3 }
0x1219   :  { %1332 = vrot.lane.b32.xlu0 %v2078_v44, %s2159_s3 }
0x121b   :  { %v2080_v45 = vpop.eup %2079 }
0x121c   :  { %v2082_v2 = vpop.eup %2081  ;;  %1338 = vrot.lane.b32.xlu1 %v2080_v45, %s2159_s3 }
0x121d   :  { %1336 = vrot.lane.b32.xlu0 %v2082_v2, %s2159_s3 }
0x128a   :  { %v1335_v10 = vpop.permute.xlu1 %1334 }
0x128b   :  { %v1345_v50 = vmul.f32 %v1335_v10, %v1325_v13  ;;  %v1333_v51 = vpop.permute.xlu0 %1332 }
0x128c   :  { %v1344_v20 = vmul.f32 %v1333_v51, %v1324_v49 }
0x128d   :  { %v2602_v55 = vadd.f32 %v1361_v11, %v1345_v50 }
0x128e   :  { %v2605_v23 = vadd.f32 %v1360_v52, %v1344_v20  ;;  %v1339_v4 = vpop.permute.xlu1 %1338 }
0x128f   :  { %v1369_v22 = vpack.c.bf16 %v2602_v55, %v2602_v55  ;;  %v1347_v61 = vmul.f32 %v1339_v4, %v1327_v57  ;;  %v1337_v62 = vpop.permute.xlu0 %1336 }
0x1290   :  { %v1368_v63 = vpack.c.bf16 %v2605_v23, %v2605_v23  ;;  %v1346_v38 = vmul.f32 %v1337_v62, %v1326_v60 }
0x1291   :  { %v1377_v3 = vunpack.c.l.b16 %v1369_v22  ;;  %v2611_v37 = vadd.f32 %v1363_v28, %v1347_v61 }
0x1292   :  { %v1376_v5 = vunpack.c.l.b16 %v1368_v63  ;;  %v2613_v47 = vadd.f32 %v1362_v1, %v1346_v38 }
0x1293   :  { %v1381_v7 = vrot.slane %v1377_v3, 5  ;;  %v1371_v8 = vpack.c.bf16 %v2611_v37, %v2611_v37 }
0x1294   :  { %v1380_v35 = vrot.slane %v1376_v5, 6  ;;  %v1370_v12 = vpack.c.bf16 %v2613_v47, %v2613_v47 }
0x1295   :  { %v1379_v14 = vunpack.c.l.b16 %v1371_v8 }
0x1296   :  { %v1378_v15 = vunpack.c.l.b16 %v1370_v12  ;;  %v1382_v16 = vsel %vm317_vm2, %v1381_v7, %v1380_v35 }
0x1297   :  { %v1385_v17 = vrot.slane %v1379_v14, 3 }
0x1298   :  { %v1383_v18 = vrot.slane %v1378_v15, 4 }
0x129a   :  { %v1384_v19 = vsel %vm320_vm3, %v1383_v18, %v1382_v16 }
0x129b   :  { %v1386_v21 = vsel %vm323_vm4, %v1385_v17, %v1384_v19  ;;  %v1970_v19 = vld [vmem:[%s2704_s5] sm:$0xff]  }
0x129c   :  { %v1387_v56 = vpack.c.b16 %v1386_v21, %v1386_v21 }
0x129e   :  { %1388 = vrot.lane.b32.xlu0 %v1387_v56, %s2159_s3  ;;  %v2104_v56 = vld [vmem:[#allocation2] sm:$0xff] }
0x1310   :  { %v1389_v24 = vpop.permute.xlu0 %1388 }
0x1311   :  { %1931 = vmatmul.mubr.msk.bf16.vlgmr.msra.gmra.mxu0 %vm160_vm5, %v1389_v24 }
0x1312   :  { %1944 = vmatprep.mubr.msk.bf16.mxu0 %vm2156_vm0, %v2155_v0 }
0x13d1   :  { %v1427_v48 = vpop.f32.mrf.mxu0 }
0x13d2   :  { %v1428_v29 = vadd.f32 %v2528_v39, %v1427_v48  ;;  %v2105_v48 = vld [vmem:[#allocation2 + $0x8] sm:$0xff] }
0x13d3   :  { %v1932_v31 = vpop.f32.mrf.mxu0 }
0x13d4   :  { %v1435_v32 = vrot.slane %v1428_v29, 2  ;;  %v1434_v33 = vrot.slane %v1428_v29, 1  ;;  %v1437_v36 = vrot.slane %v1428_v29, 4  ;;  %v1436_v6 = vrot.slane %v1428_v29, 3  ;;  %v2106_v31 = vld [vmem:[#allocation2 + $0x10] sm:$0xff] }
0x13d5   :  { %v1430_v34 = vpop.f32.mrf.mxu0 }
0x13d6   :  { %1464 = vrot.lane.b32.xlu0 %v1435_v32, %s2158_s22  ;;  %1462 = vrot.lane.b32.xlu1 %v1434_v33, %s2158_s22  ;;  %v1443_v40 = vadd.f32 %v1435_v32, %v2262_v25  ;;  %v1442_v59 = vadd.f32 %v1434_v33, %v2264_v26  ;;  %v1445_v41 = vadd.f32 %v1437_v36, %v2270_v30  ;;  %v2107_v33 = vld [vmem:[#allocation2 + $0x18] sm:$0xff] }
0x13d7   :  { %v1933_v54 = vpop.f32.mrf.mxu0  ;;  %v1444_v43 = vadd.f32 %v1436_v6, %v2266_v27 }
0x13d8   :  { %v1447_v39 = vmul.f32 0.5, %v1443_v40  ;;  %v1446_v42 = vmul.f32 0.5, %v1442_v59  ;;  %v1449_v44 = vmul.f32 0.5, %v1445_v41 }
0x13d9   :  { %v1448_v45 = vmul.f32 0.5, %v1444_v43 }
0x13da   :  { %1468 = vrot.lane.b32.xlu0 %v1437_v36, %s2158_s22  ;;  %1466 = vrot.lane.b32.xlu1 %v1436_v6, %s2158_s22  ;;  %2083 = vtanh.f32 %v1447_v39 }
0x13db   :  { %2085 = vtanh.f32 %v1446_v42 }
0x13dc   :  { %2087 = vtanh.f32 %v1449_v44 }
0x13dd   :  { %2089 = vtanh.f32 %v1448_v45 }
0x13e7   :  { %v2084_v2 = vpop.eup %2083 }
0x13e8   :  { %v2086_v46 = vpop.eup %2085  ;;  %v1455_v9 = vmul.f32 0.5, %v2084_v2 }
0x13e9   :  { %v2088_v13 = vpop.eup %2087  ;;  %v1454_v10 = vmul.f32 0.5, %v2086_v46 }
0x13ea   :  { %v2090_v49 = vpop.eup %2089  ;;  %v2635_v11 = vadd.f32 0.5, %v1455_v9  ;;  %v1457_v51 = vmul.f32 0.5, %v2088_v13 }
0x13eb   :  { %v2637_v50 = vadd.f32 0.5, %v1454_v10  ;;  %v1456_v52 = vmul.f32 0.5, %v2090_v49 }
0x13ec   :  { %v2643_v4 = vadd.f32 0.5, %v1457_v51 }
0x13ed   :  { %v2645_v60 = vadd.f32 0.5, %v1456_v52 }
0x1448   :  { %v1465_v20 = vpop.permute.xlu0 %1464  ;;  %v1463_v53 = vpop.permute.xlu1 %1462 }
0x1449   :  { %v1475_v57 = vmul.f32 %v1465_v20, %v2635_v11  ;;  %v1474_v58 = vmul.f32 %v1463_v53, %v2637_v50 }
0x144b   :  { %1484 = vrot.lane.b32.xlu0 %v1475_v57, %s2158_s22  ;;  %1482 = vrot.lane.b32.xlu1 %v1474_v58, %s2158_s22 }
0x144c   :  { %v1469_v22 = vpop.permute.xlu0 %1468  ;;  %v1467_v28 = vpop.permute.xlu1 %1466 }
0x144d   :  { %v1477_v61 = vmul.f32 %v1469_v22, %v2643_v4  ;;  %v1476_v62 = vmul.f32 %v1467_v28, %v2645_v60 }
0x144f   :  { %1488 = vrot.lane.b32.xlu0 %v1477_v61, %s2158_s22  ;;  %1486 = vrot.lane.b32.xlu1 %v1476_v62, %s2158_s22 }
0x14bd   :  { %v1485_v63 = vpop.permute.xlu0 %1484  ;;  %v1483_v1 = vpop.permute.xlu1 %1482 }
0x14be   :  { %v1495_v38 = vadd.f32 %v1485_v63, %v2262_v25  ;;  %v1494_v3 = vadd.f32 %v1483_v1, %v2264_v26  ;;  %v1634_v26 = vld [vmem:[%s2707_s8] sm:$0xf] }
0x14bf   :  { %1948 = vpush %v1634_v26  ;;  %v1643_v16 = vrot.slane %v1634_v26, 1  ;;  %v1667_v17 = vrot.slane %v1634_v26, 2  ;;  %v1691_v18 = vrot.slane %v1634_v26, 3 }
0x14c0   :  { %2091 = vtanh.f32 %v1495_v38 }
0x14c1   :  { %2093 = vtanh.f32 %v1494_v3  ;;  %v1489_v5 = vpop.permute.xlu0 %1488  ;;  %v1487_v7 = vpop.permute.xlu1 %1486  ;;  %1950 = vpush %v1643_v16 }
0x14c2   :  { %v1497_v8 = vadd.f32 %v1489_v5, %v2270_v30  ;;  %v1496_v35 = vadd.f32 %v1487_v7, %v2266_v27  ;;  %v1968_v27 = vld [vmem:[%s2706_s7] sm:$0xff]   ;;  %v1969_v30 = vld [vmem:[%s2704_s5 + $0x8] sm:$0xff]   ;;  %1952 = vpush %v1667_v17 }
0x14c3   :  { %1943 = vmatpush3.bf16.msra.mxu0 %v1968_v27  ;;  %1935 = vmatpush3.bf16.msra.mxu1 %v1969_v30  ;;  %1954 = vpush %v1691_v18 }
0x14c4   :  { %2095 = vtanh.f32 %v1497_v8  ;;  %1936 = vmatprep.subr.bf16.mxu1 %v2155_v0 }
0x14c5   :  { %2097 = vtanh.f32 %v1496_v35 }
0x14c7   :  { %1937 = vmatpush3.bf16.msra.mxu1 %v1970_v19 }
0x14cd   :  { %v2092_v12 = vpop.eup %2091 }
0x14ce   :  { %v2094_v14 = vpop.eup %2093  ;;  %1512 = vrot.lane.b32.xlu0 %v2092_v12, %s2159_s3 }
0x14cf   :  { %1510 = vrot.lane.b32.xlu1 %v2094_v14, %s2159_s3 }
0x14d1   :  { %v2096_v15 = vpop.eup %2095 }
0x14d2   :  { %v2098_v25 = vpop.eup %2097  ;;  %1516 = vrot.lane.b32.xlu0 %v2096_v15, %s2159_s3 }
0x14d3   :  { %1514 = vrot.lane.b32.xlu1 %v2098_v25, %s2159_s3 }
0x14f0   :  { %s1949_s7 = spop %1948 }
0x14f1   :  { %v1637_v21 = vstv %s1949_s7 }
0x14f2   :  { %v1639_v24 = vmul.f32 %v2104_v56, %v1637_v21  ;;  %s1951_s8 = spop %1950  ;;  %v1640_v29 = vmul.f32 %v2105_v48, %v1637_v21  ;;  %v1641_v32 = vmul.f32 %v2106_v31, %v1637_v21  ;;  %v1642_v34 = vmul.f32 %v2107_v33, %v1637_v21 }
0x14f3   :  { %v1645_v54 = vstv %s1951_s8  ;;  %s1953_s16 = spop %1952 }
0x14f4   :  { %v1647_v36 = vmul.f32 %v2104_v56, %v1645_v54  ;;  %v1648_v6 = vmul.f32 %v2105_v48, %v1645_v54  ;;  %v1649_v40 = vmul.f32 %v2106_v31, %v1645_v54  ;;  %v1650_v0 = vmul.f32 %v2107_v33, %v1645_v54  ;;  %s1955_s5 = spop %1954 }
0x14f5   :  { %v1669_v59 = vstv %s1953_s16  ;;  %v1693_v39 = vstv %s1955_s5  ;;  %v1503_v54 = vsub.f32 1.0, %v2635_v11 }
0x14f6   :  { %v1655_v41 = vrot.slane %v1647_v36, 1  ;;  %v1656_v42 = vrot.slane %v1648_v6, 1  ;;  %v1657_v43 = vrot.slane %v1649_v40, 1  ;;  %v1658_v44 = vrot.slane %v1650_v0, 1 }
0x14f7   :  { %v1671_v45 = vmul.f32 %v2104_v56, %v1669_v59  ;;  %v1672_v2 = vmul.f32 %v2105_v48, %v1669_v59  ;;  %v1673_v46 = vmul.f32 %v2106_v31, %v1669_v59  ;;  %v1674_v13 = vmul.f32 %v2107_v33, %v1669_v59 }
0x14f8   :  { %v1663_v9 = vadd.f32 %v1655_v41, %v1639_v24  ;;  %v1664_v10 = vadd.f32 %v1656_v42, %v1640_v29  ;;  %v1665_v49 = vadd.f32 %v1657_v43, %v1641_v32  ;;  %v1666_v51 = vadd.f32 %v1658_v44, %v1642_v34 }
0x14f9   :  { %v1679_v52 = vrot.slane %v1671_v45, 2  ;;  %v1680_v20 = vrot.slane %v1672_v2, 2  ;;  %v1681_v53 = vrot.slane %v1673_v46, 2  ;;  %v1682_v57 = vrot.slane %v1674_v13, 2 }
0x14fa   :  { %v1695_v58 = vmul.f32 %v2104_v56, %v1693_v39  ;;  %v1696_v22 = vmul.f32 %v2105_v48, %v1693_v39  ;;  %v1697_v28 = vmul.f32 %v2106_v31, %v1693_v39  ;;  %v1698_v61 = vmul.f32 %v2107_v33, %v1693_v39 }
0x14fb   :  { %v1687_v62 = vadd.f32 %v1679_v52, %v1663_v9  ;;  %v1688_v63 = vadd.f32 %v1680_v20, %v1664_v10  ;;  %v1689_v1 = vadd.f32 %v1681_v53, %v1665_v49  ;;  %v1690_v38 = vadd.f32 %v1682_v57, %v1666_v51 }
0x14fc   :  { %v1703_v3 = vrot.slane %v1695_v58, 3  ;;  %v1704_v5 = vrot.slane %v1696_v22, 3  ;;  %v1705_v7 = vrot.slane %v1697_v28, 3  ;;  %v1706_v8 = vrot.slane %v1698_v61, 3 }
0x14fd   :  { %v1531_v34 = vrot.slane %v2602_v55, 7  ;;  %v1530_v36 = vrot.slane %v2605_v23, 7  ;;  %v1502_v40 = vsub.f32 1.0, %v2637_v50  ;;  %v1533_v43 = vrot.slane %v2611_v37, 7 }
0x14fe   :  { %v1711_v35 = vadd.f32 %v1703_v3, %v1687_v62  ;;  %v1712_v12 = vadd.f32 %v1704_v5, %v1688_v63  ;;  %v1713_v14 = vadd.f32 %v1705_v7, %v1689_v1  ;;  %v1714_v15 = vadd.f32 %v1706_v8, %v1690_v38 }
0x14ff   :  { %v1539_v0 = vmul.f32 %v1531_v34, %v2635_v11  ;;  %v1538_v41 = vmul.f32 %v1530_v36, %v2637_v50  ;;  %v1505_v45 = vsub.f32 1.0, %v2643_v4  ;;  %v1532_v55 = vrot.slane %v2613_v47, 7 }
0x1500   :  { %v1715_v25 = vpack.c.bf16 %v1711_v35, %v1711_v35  ;;  %v1716_v26 = vpack.c.bf16 %v1712_v12, %v1712_v12  ;;  %v1717_v27 = vpack.c.bf16 %v1713_v14, %v1713_v14  ;;  %v1718_v30 = vpack.c.bf16 %v1714_v15, %v1714_v15  ;;  %v1824_v12 = vld [vmem:[%s2705_s6] ss:$0 sm:$0xff] }
0x1501   :  { %v1504_v23 = vsub.f32 1.0, %v2645_v60  ;;  %v1541_v9 = vmul.f32 %v1533_v43, %v2643_v4  ;;  %v1540_v50 = vmul.f32 %v1532_v55, %v2645_v60 }
0x1502   :  { %v1725_v16 = vunpack.c.l.b16 %v1715_v25  ;;  %v1726_v17 = vunpack.c.l.b16 %v1716_v26  ;;  %v1727_v18 = vunpack.c.l.b16 %v1717_v27  ;;  %v1728_v19 = vunpack.c.l.b16 %v1718_v30 }
0x1504   :  { %v1729_v21 = vrot.slane %v1725_v16, 4  ;;  %v1730_v56 = vrot.slane %v1726_v17, 3  ;;  %v1732_v24 = vrot.slane %v1727_v18, 2  ;;  %v1734_v48 = vrot.slane %v1728_v19, 1 }
0x1506   :  { %v1731_v29 = vsel %vm317_vm2, %v1730_v56, %v1729_v21 }
0x1507   :  { %v1733_v31 = vsel %vm320_vm3, %v1732_v24, %v1731_v29 }
0x1508   :  { %v1735_v32 = vsel %vm323_vm4, %v1734_v48, %v1733_v31 }
0x1509   :  { %v1736_v33 = vpack.c.b16 %v1735_v32, %v1735_v32 }
0x150b   :  { %1945 = vmatmul.mubr.msk.bf16.vlgmr.msra.gmra.mxu0 %vm81_vm1, %v1736_v33 }
0x1540   :  { %v1513_v6 = vpop.permute.xlu0 %1512 }
0x1541   :  { %v1523_v59 = vmul.f32 %v1513_v6, %v1503_v54  ;;  %v1511_v39 = vpop.permute.xlu1 %1510 }
0x1542   :  { %v1522_v42 = vmul.f32 %v1511_v39, %v1502_v40 }
0x1543   :  { %v1543_v44 = vadd.f32 %v1539_v0, %v1523_v59 }
0x1544   :  { %v1542_v2 = vadd.f32 %v1538_v41, %v1522_v42  ;;  %v1517_v46 = vpop.permute.xlu0 %1516 }
0x1545   :  { %v1547_v13 = vpack.c.bf16 %v1543_v44, %v1543_v44  ;;  %v1525_v11 = vmul.f32 %v1517_v46, %v1505_v45  ;;  %v1515_v10 = vpop.permute.xlu1 %1514 }
0x1546   :  { %v1546_v49 = vpack.c.bf16 %v1542_v2, %v1542_v2  ;;  %v1524_v51 = vmul.f32 %v1515_v10, %v1504_v23 }
0x1547   :  { %v1566_v52 = vunpack.c.l.b16 %v1547_v13  ;;  %v1545_v37 = vadd.f32 %v1541_v9, %v1525_v11 }
0x1548   :  { %v1565_v20 = vunpack.c.l.b16 %v1546_v49  ;;  %v1544_v53 = vadd.f32 %v1540_v50, %v1524_v51 }
0x1549   :  { %v1570_v57 = vrot.slane %v1566_v52, 6  ;;  %v1549_v58 = vpack.c.bf16 %v1545_v37, %v1545_v37 }
0x154a   :  { %v1569_v47 = vrot.slane %v1565_v20, 7  ;;  %v1548_v22 = vpack.c.bf16 %v1544_v53, %v1544_v53 }
0x154b   :  { %v1568_v28 = vunpack.c.l.b16 %v1549_v58 }
0x154c   :  { %v1571_v61 = vsel %vm317_vm2, %v1570_v57, %v1569_v47  ;;  %v1567_v62 = vunpack.c.l.b16 %v1548_v22 }
0x154d   :  { %v1574_v63 = vrot.slane %v1568_v28, 4 }
0x154e   :  { %v1572_v4 = vrot.slane %v1567_v62, 5 }
0x1550   :  { %v1573_v1 = vsel %vm320_vm3, %v1572_v4, %v1571_v61 }
0x1551   :  { %v1575_v38 = vsel %vm323_vm4, %v1574_v63, %v1573_v1 }
0x1552   :  { %v1576_v60 = vpack.c.b16 %v1575_v38, %v1575_v38 }
0x1554   :  { %1577 = vrot.lane.b32.xlu1 %v1576_v60, %s2159_s3 }
0x15c6   :  { %v1578_v3 = vpop.permute.xlu1 %1577 }
0x15c7   :  { %1939 = vmatmul.mubr.msk.bf16.vlgmr.msra.gmra.mxu1 %vm160_vm5, %v1578_v3 }
0x15cb   :  { %v1780_v5 = vpop.f32.mrf.mxu0 }
0x15cd   :  { %v1946_v7 = vpop.f32.mrf.mxu0 }
0x15cf   :  { %v1783_v8 = vpop.f32.mrf.mxu0 }
0x15d1   :  { %v1947_v35 = vpop.f32.mrf.mxu0 }
0x1687   :  { %v1628_v14 = vpop.f32.mrf.mxu1 }
0x1688   :  { %v1629_v15 = vadd.f32 %v1824_v12, %v1628_v14 }
0x1689   :  { %v1940_v25 = vpop.f32.mrf.mxu1 }
0x168a   :  { %v1786_v26 = vadd.f32 %v1780_v5, %v1629_v15 }
0x168b   :  { %v1631_v27 = vpop.f32.mrf.mxu1 }
0x168c   :  { %v1787_v30 = vmul.f32 0.5, %v1786_v26 }
0x168d   :  { %v1941_v16 = vpop.f32.mrf.mxu1 }
0x168e   :  { %2099 = vtanh.f32 %v1787_v30 }
0x169b   :  { %v2100_v17 = vpop.eup %2099 }
0x169c   :  { %v1789_v18 = vmul.f32 0.5, %v2100_v17 }
0x169e   :  { %v1790_v19 = vadd.f32 0.5, %v1789_v18 }
0x16a0   :  { %1792 = vst.msk [vmem:[#allocation5] sm:$0xf] %vm1791_vm6, %v1790_v19 }
0x16a1   :  { %2139 = shalt.err (!%p2136_p9)
}
0x16a2   :  { %1802 = dma.vmem_to_hbm [thread:$0]  %s1800_s0, 64, %s2708_s9, [#allocation4]  }
0x16a3   :  { %2150 = dma.done.wait [#allocation4], 64  }
0x16a4   :  { %2151 = vsyncadd [#allocation4], 4294967232 }
0x16a5   :  { %1806 = vsyncpa [#allocation3], 1 }
0x16a6   :  { %1807 = vsyncpa [#allocation4], 1 }

</bundles_post_ra>
